<compile_context>
chip_gen: v5e
topology: v5e:2x2
jax: 0.10.0
libtpu: 0.0.40
codegen_flags: <defaults>
</compile_context>

<pallas_src>
import functools
import math

import jax
import jax.numpy as jnp
from jax import lax
from jax.experimental import pallas as pl
from jax.experimental.pallas import tpu as pltpu


def _mhsa_kernel(x_ref, wq_ref, bq_ref, wkv_ref, bkv_ref, wo_ref, bo_ref,
                 out_ref, kv_ref, cc_ref, *,
                 num_heads, q_tile, per_head, exp_dtype):
    """One (batch element, query tile) grid step.

    x_ref:   (1, S, E)  f32  full sequence of the current batch element
                             (block index constant across query tiles -> one DMA per b)
    wq_ref:  (E, E) bf16 block-diag, pre-scaled by 1/sqrt(Dh)   [per_head=False]
             (H, Dh, Dh) bf16 pre-scaled                        [per_head=True ]
    bq_ref:  (1, E) / (H, Dh)   f32 (scale folded in)
    wkv_ref: (E, 2E) bf16 block-diag [K | V]                    [per_head=False]
             (H, Dh, 2Dh) bf16 [K_h | V_h]                      [per_head=True ]
    bkv_ref: (1, 2E) / (H, 2Dh) f32
    wo_ref:  (E, E_out) bf16   (E_out = E padded up to a lane multiple)
    bo_ref:  (1, E_out) f32
    out_ref: (1, Tq, E_out) f32
    kv_ref:  (S, 2E) bf16 VMEM scratch  -- K at [:, :E], V at [:, E:]
    cc_ref:  (Tq, E) bf16 VMEM scratch  -- concatenated head outputs
    """
    S = x_ref.shape[1]
    E = x_ref.shape[2]
    Dh = E // num_heads
    qi = pl.program_id(1)

    # ---- K/V projection for the full sequence, once per batch element ------
    @pl.when(qi == 0)
    def _():
        if per_head:
            for h in range(num_heads):
                sl = slice(h * Dh, (h + 1) * Dh)
                x_h = x_ref[0, :, sl].astype(jnp.bfloat16)                # (S, Dh)
                kv_h = jnp.dot(x_h, wkv_ref[h],
                               preferred_element_type=jnp.float32)        # (S, 2Dh)
                kv_h = kv_h + bkv_ref[h]
                kv_ref[:, sl] = kv_h[:, :Dh].astype(jnp.bfloat16)         # K_h
                kv_ref[:, E + h * Dh:E + (h + 1) * Dh] = (
                    kv_h[:, Dh:].astype(jnp.bfloat16))                    # V_h
        else:
            xb = x_ref[0].astype(jnp.bfloat16)                            # (S, E)
            kv = jnp.dot(xb, wkv_ref[...],
                         preferred_element_type=jnp.float32)              # (S, 2E)
            kv_ref[...] = (kv + bkv_ref[...]).astype(jnp.bfloat16)

    # ---- Q projection for this query tile (1/sqrt(Dh) pre-folded) ----------
    q_start = pl.multiple_of(qi * q_tile, q_tile)
    x_q = x_ref[0, pl.ds(q_start, q_tile), :].astype(jnp.bfloat16)        # (Tq, E)

    def attend(q_h, h):
        sl = slice(h * Dh, (h + 1) * Dh)
        k_h = kv_ref[:, sl]                                               # (S, Dh)
        v_h = kv_ref[:, E + h * Dh:E + (h + 1) * Dh]                      # (S, Dh)
        # Contract last dims (no XLU transpose of K).
        s = lax.dot_general(q_h, k_h, (((1,), (1,)), ((), ())),
                            preferred_element_type=jnp.float32)           # (Tq, S)
        m = jnp.max(s, axis=-1, keepdims=True)                            # f32
        p = jnp.exp((s - m).astype(exp_dtype))                            # EUP
        denom = jnp.sum(p.astype(jnp.float32), axis=-1, keepdims=True)    # f32
        inv = pl.reciprocal(denom, approx=True).astype(exp_dtype)         # EUP
        attn = (p * inv).astype(jnp.bfloat16)
        cc_ref[:, sl] = jnp.dot(attn, v_h,
                                preferred_element_type=jnp.float32
                                ).astype(jnp.bfloat16)                    # (Tq, Dh)

    if per_head:
        for h in range(num_heads):
            sl = slice(h * Dh, (h + 1) * Dh)
            q_h = jnp.dot(x_q[:, sl], wq_ref[h],
                          preferred_element_type=jnp.float32) + bq_ref[h]
            attend(q_h.astype(jnp.bfloat16), h)
    else:
        q = jnp.dot(x_q, wq_ref[...],
                    preferred_element_type=jnp.float32) + bq_ref[...]
        q = q.astype(jnp.bfloat16)                                        # (Tq, E)
        for h in range(num_heads):
            attend(q[:, h * Dh:(h + 1) * Dh], h)

    # ---- output projection over the concatenated heads ---------------------
    out = jnp.dot(cc_ref[...], wo_ref[...], preferred_element_type=jnp.float32)
    out_ref[0] = (out + bo_ref[...]).astype(out_ref.dtype)


def pack_params(params, lane=128):
    """Fold the attention scale into Wq/bq and pack weights for the kernel.

    * Dh <  lane: per-head Q/K/V weights packed into block-diagonal (E, *)
      matrices (exact -- heads act on disjoint input slices), so the
      projections become single MXU-friendly matmuls.
    * Dh >= lane: weights stay per-head (H, Dh, *) -- block-diagonal packing
      would inflate MXU work and weight VMEM/HBM by Hx with zeros.
    """
    H = int(params["num_heads"])
    Dh = params["wq_t"].shape[-1]
    E = H * Dh
    scale = 1.0 / math.sqrt(Dh)
    per_head = Dh >= lane

    wq = params["wq_t"] * scale                        # (H, Dh, Dh) pre-scaled
    bq = params["bq"] * scale                          # (H, Dh)    pre-scaled
    wk, bk = params["wk_t"], params["bk"]
    wv, bv = params["wv_t"], params["bv"]

    if per_head:
        wq_p, bq_p = wq, bq
        wkv_p = jnp.concatenate([wk, wv], axis=-1)     # (H, Dh, 2Dh)
        bkv_p = jnp.concatenate([bk, bv], axis=-1)     # (H, 2Dh)
    else:
        def block_diag(blocks):                        # (H, Dh, Dh) -> (E, E)
            m = jnp.zeros((E, E), blocks.dtype)
            for h in range(H):
                m = m.at[h * Dh:(h + 1) * Dh, h * Dh:(h + 1) * Dh].set(blocks[h])
            return m
        wq_p = block_diag(wq)                                          # (E, E)
        bq_p = bq.reshape(1, E)
        wkv_p = jnp.concatenate([block_diag(wk), block_diag(wv)], 1)   # (E, 2E)
        bkv_p = jnp.concatenate([bk.reshape(-1), bv.reshape(-1)]).reshape(1, 2 * E)

    # Lane-dense output projection: pad E_out up to a multiple of 128.  When E
    # is already a multiple of 128 (the common case) no padding and no wrapper
    # slice happen at all.
    E_out = ((E + lane - 1) // lane) * lane
    wo, bo = params["wo_t"], params["bo"]
    if E_out != E:
        wo = jnp.pad(wo, ((0, 0), (0, E_out - E)))
        bo = jnp.pad(bo, ((0, E_out - E),))

    return {
        "num_heads": H,
        "embed_dim": E,
        "per_head": per_head,
        "wq": wq_p.astype(jnp.bfloat16),
        "bq": bq_p.astype(jnp.float32),
        "wkv": wkv_p.astype(jnp.bfloat16),
        "bkv": bkv_p.astype(jnp.float32),
        "wo": wo.astype(jnp.bfloat16),
        "bo": bo.reshape(1, E_out).astype(jnp.float32),
    }


def _physical_vmem_bytes():
    try:
        return int(pltpu.get_tpu_info().vmem_capacity_bytes)
    except Exception:
        return 64 * 1024 * 1024          # assume the smallest (v7x per-TC) VMEM


def multi_head_self_attention(x, packed, *, q_tile=None,
                              exp_dtype=jnp.float32,
                              single_buffer_weights=True):
    """x: (B, S, E) float32 -> (B, S, E) float32.

    exp_dtype: jnp.float32 (safe everywhere, required on v5e) or jnp.bfloat16
    (v6e/v7x: halves the S^2 softmax data path; max/denominator stay f32).
    """
    B, S, E = x.shape
    H = packed["num_heads"]
    per_head = packed["per_head"]
    assert E == packed["embed_dim"]
    Dh = E // H
    E_out = packed["wo"].shape[1]

    if q_tile is None:                       # largest "nice" tile dividing S
        q_tile = S
        for t in (256, 128):
            if S % t == 0:
                q_tile = t
                break
    assert S % q_tile == 0 and (q_tile == S or q_tile % 8 == 0)
    nq = S // q_tile

    weight_keys = ("wq", "bq", "wkv", "bkv", "wo", "bo")
    weight_bytes = sum(int(packed[k].size) * packed[k].dtype.itemsize
                       for k in weight_keys)

    # Honest scheduler hint: useful flops (per-head QKV), not block-diag flops.
    flops = B * (6 * S * Dh * E            # Q/K/V projections (all heads)
                 + 4 * S * S * E           # scores + attn @ V (all heads)
                 + 2 * S * E * E_out)      # output projection
    cost = pl.CostEstimate(
        flops=int(flops),
        transcendentals=int(B * H * S * S),
        bytes_accessed=int(x.size * x.dtype.itemsize + weight_bytes
                           + B * S * E_out * 4))

    kernel = functools.partial(_mhsa_kernel, num_heads=H, q_tile=q_tile,
                               per_head=per_head, exp_dtype=exp_dtype)
    operands = (x, packed["wq"], packed["bq"], packed["wkv"], packed["bkv"],
                packed["wo"], packed["bo"])
    vmem_cap = _physical_vmem_bytes()

    def run(single_buffer):
        # Weight/bias blocks have constant index maps -> fetched once; a single
        # buffer avoids reserving 2x their VMEM footprint.
        pm = pl.Buffered(1) if single_buffer else None

        def wspec(arr):
            nd = arr.ndim
            if pm is None:
                return pl.BlockSpec(arr.shape, lambda b, qi: (0,) * nd)
            return pl.BlockSpec(arr.shape, lambda b, qi: (0,) * nd,
                                pipeline_mode=pm)

        # VMEM budget derived from actual block / scratch sizes (+ headroom),
        # capped at 3/4 of physical VMEM (<= 48 MiB on v7x).
        wmul = 1 if single_buffer else 2
        vmem_needed = (2 * S * E * x.dtype.itemsize        # x block (2 bufs)
                       + 2 * q_tile * E_out * 4            # out block (2 bufs)
                       + S * 2 * E * 2                     # K|V scratch (bf16)
                       + q_tile * E * 2                    # concat scratch
                       + wmul * weight_bytes
                       + q_tile * S * 4                    # score tile (f32)
                       + (q_tile + S) * 3 * E * 4)         # projection transients
        vmem_limit = max(16 << 20,
                         min(int(vmem_needed * 1.25) + (2 << 20),
                             (vmem_cap * 3) // 4))

        return pl.pallas_call(
            kernel,
            out_shape=jax.ShapeDtypeStruct((B, S, E_out), jnp.float32),
            grid_spec=pltpu.PrefetchScalarGridSpec(
                num_scalar_prefetch=0,
                grid=(B, nq),
                in_specs=[
                    # full sequence; block index constant in qi -> one DMA per b
                    pl.BlockSpec((1, S, E), lambda b, qi: (b, 0, 0)),
                    wspec(packed["wq"]), wspec(packed["bq"]),
                    wspec(packed["wkv"]), wspec(packed["bkv"]),
                    wspec(packed["wo"]), wspec(packed["bo"]),
                ],
                out_specs=pl.BlockSpec((1, q_tile, E_out),
                                       lambda b, qi: (b, qi, 0)),
                scratch_shapes=[
                    pltpu.VMEM((S, 2 * E), jnp.bfloat16),    # K | V cache (per b)
                    pltpu.VMEM((q_tile, E), jnp.bfloat16),   # head-output concat
                ],
            ),
            # The query-tile axis must stay "arbitrary": K/V are cached in
            # scratch at qi == 0 and reused by later tiles of the same batch
            # element.  The batch axis is "parallel" (megacore / 2-TC v7x).
            compiler_params=pltpu.CompilerParams(
                dimension_semantics=("parallel", "arbitrary"),
                vmem_limit_bytes=int(vmem_limit)),
            cost_estimate=cost,
        )(*operands)

    try:
        out = run(single_buffer_weights)
    except Exception:
        if not single_buffer_weights:
            raise
        out = run(False)        # pl.Buffered(1) rejected -> default buffering

    return out if E_out == E else out[:, :, :E]


def init_params(key, embedding_dim, num_heads):
    H = num_heads
    Dh = embedding_dim // H
    E = embedding_dim
    ks = jax.random.split(key, 8)

    def uniform(k, shape, bound):
        return jax.random.uniform(k, shape, jnp.float32, -bound, bound)

    lin_bound = 1.0 / math.sqrt(Dh)               # nn.Linear default
    xavier_bound = math.sqrt(6.0 / (E + E))       # xavier_uniform_ for W_O

    # Stored pre-transposed so x @ W == Linear(x).
    return {
        "num_heads": H,
        "wq_t": uniform(ks[0], (H, Dh, Dh), lin_bound),
        "bq":   uniform(ks[1], (H, Dh), lin_bound),
        "wk_t": uniform(ks[2], (H, Dh, Dh), lin_bound),
        "bk":   uniform(ks[3], (H, Dh), lin_bound),
        "wv_t": uniform(ks[4], (H, Dh, Dh), lin_bound),
        "bv":   uniform(ks[5], (H, Dh), lin_bound),
        "wo_t": uniform(ks[6], (E, E), xavier_bound),   # == W_O.weight.T
        "bo":   uniform(ks[7], (E,), 1.0 / math.sqrt(E)),
    }


def reference(x, params):
    """Pure-JAX f32 reference mirroring the PyTorch forward."""
    B, S, E = x.shape
    H = params["num_heads"]
    Dh = E // H
    head_outs = []
    for h in range(H):
        xh = x[:, :, h * Dh:(h + 1) * Dh]
        q = xh @ params["wq_t"][h] + params["bq"][h]
        k = xh @ params["wk_t"][h] + params["bk"][h]
        v = xh @ params["wv_t"][h] + params["bv"][h]
        scores = jnp.einsum("bqd,bkd->bqk", q, k) / math.sqrt(Dh)
        attn = jax.nn.softmax(scores, axis=-1)
        head_outs.append(jnp.einsum("bqk,bkd->bqd", attn, v))
    concat = jnp.concatenate(head_outs, axis=-1)
    return concat @ params["wo_t"] + params["bo"]


if __name__ == "__main__":
    key = jax.random.PRNGKey(0)
    k1, k2, k3, k4 = jax.random.split(key, 4)

    # Case 1: small head dim (Dh < 128) -> block-diagonal fused QKV path,
    # padded/lane-dense output projection, single query tile.
    B, S, E, H = 2, 8, 32, 4
    x = jax.random.normal(k1, (B, S, E), jnp.float32)
    params = init_params(k2, E, H)
    packed = pack_params(params)
    out = jax.block_until_ready(multi_head_self_attention(x, packed))
    ref = reference(x, params)
    assert out.shape == (B, S, E)
    # bf16 MXU operands + approx reciprocal -> relaxed tolerance vs f32 ref.
    assert jnp.allclose(out, ref, atol=5e-2, rtol=5e-2), "case1 mismatch"

    # Case 2: Dh >= 128 -> per-head weights (no block-diag zero padding) and
    # two query tiles (exercises the per-batch K/V scratch caching).
    B2, S2, E2, H2 = 1, 256, 256, 2
    x2 = jax.random.normal(k3, (B2, S2, E2), jnp.float32)
    params2 = init_params(k4, E2, H2)
    packed2 = pack_params(params2)
    out2 = jax.block_until_ready(
        multi_head_self_attention(x2, packed2, q_tile=128))
    ref2 = reference(x2, params2)
    assert out2.shape == (B2, S2, E2)
    assert jnp.allclose(out2, ref2, atol=5e-2, rtol=5e-2), "case2 mismatch"

    print("KERNEL_OK")
</pallas_src>

<mosaic_0001>
module attributes {stable_mosaic.version = 11 : i64} {
  func.func @_mhsa_kernel(%arg0: i32, %arg1: i32, %arg2: memref<1x8x32xf32, #tpu.memory_space<vmem>>, %arg3: memref<32x32xbf16, #tpu.memory_space<vmem>>, %arg4: memref<1x32xf32, #tpu.memory_space<vmem>>, %arg5: memref<32x64xbf16, #tpu.memory_space<vmem>>, %arg6: memref<1x64xf32, #tpu.memory_space<vmem>>, %arg7: memref<32x128xbf16, #tpu.memory_space<vmem>>, %arg8: memref<1x128xf32, #tpu.memory_space<vmem>>, %arg9: memref<1x8x128xf32, #tpu.memory_space<vmem>>, %arg10: memref<8x64xbf16, #tpu.memory_space<vmem>>, %arg11: memref<8x32xbf16, #tpu.memory_space<vmem>>) attributes {dimension_semantics = [#tpu.dimension_semantics<parallel>, #tpu.dimension_semantics<arbitrary>], iteration_bounds = array<i64: 2, 1>, scalar_prefetch = 0 : i64, scratch_operands = 2 : i64, tpu.core_type = #tpu.core_type<tc>, window_params = [{transform_indices = @transform_0, window_bounds = array<i64: 1, 8, 32>}, {pipeline_mode = #tpu.pipeline_mode<synchronous>, transform_indices = @transform_1, window_bounds = array<i64: 32, 32>}, {pipeline_mode = #tpu.pipeline_mode<synchronous>, transform_indices = @transform_2, window_bounds = array<i64: 1, 32>}, {pipeline_mode = #tpu.pipeline_mode<synchronous>, transform_indices = @transform_3, window_bounds = array<i64: 32, 64>}, {pipeline_mode = #tpu.pipeline_mode<synchronous>, transform_indices = @transform_4, window_bounds = array<i64: 1, 64>}, {pipeline_mode = #tpu.pipeline_mode<synchronous>, transform_indices = @transform_5, window_bounds = array<i64: 32, 128>}, {pipeline_mode = #tpu.pipeline_mode<synchronous>, transform_indices = @transform_6, window_bounds = array<i64: 1, 128>}, {transform_indices = @transform_7, window_bounds = array<i64: 1, 8, 128>}]} {
    %c0_i32 = arith.constant 0 : i32
    %0 = arith.cmpi eq, %arg1, %c0_i32 : i32
    %1 = arith.extui %0 : i1 to i32
    %c0_i32_0 = arith.constant 0 : i32
    %2 = arith.cmpi ne, %1, %c0_i32_0 : i32
    scf.if %2 {
      %c0_49 = arith.constant 0 : index
      %c0_50 = arith.constant 0 : index
      %c0_51 = arith.constant 0 : index
      %96 = vector.load %arg2[%c0_49, %c0_50, %c0_51] : memref<1x8x32xf32, #tpu.memory_space<vmem>>, vector<1x8x32xf32>
      %97 = vector.shape_cast %96 : vector<1x8x32xf32> to vector<8x32xf32>
      %98 = arith.truncf %97 : vector<8x32xf32> to vector<8x32xbf16>
      %c0_52 = arith.constant 0 : index
      %c0_53 = arith.constant 0 : index
      %99 = vector.load %arg5[%c0_52, %c0_53] : memref<32x64xbf16, #tpu.memory_space<vmem>>, vector<32x64xbf16>
      %cst_54 = arith.constant dense<0.000000e+00> : vector<8x64xf32>
      %100 = tpu.matmul %98, %99, %cst_54 {dimension_numbers = #tpu.dot_dimension_numbers<[1], [0], [0], [1], [0, 0, 1, 1], [], []>} : vector<8x32xbf16>, vector<32x64xbf16>, vector<8x64xf32> -> vector<8x64xf32>
      %c0_55 = arith.constant 0 : index
      %c0_56 = arith.constant 0 : index
      %101 = vector.load %arg6[%c0_55, %c0_56] : memref<1x64xf32, #tpu.memory_space<vmem>>, vector<1x64xf32>
      %102 = vector.broadcast %101 : vector<1x64xf32> to vector<8x64xf32>
      %103 = arith.addf %100, %102 : vector<8x64xf32>
      %104 = arith.truncf %103 : vector<8x64xf32> to vector<8x64xbf16>
      %c0_57 = arith.constant 0 : index
      %c0_58 = arith.constant 0 : index
      %105 = vector.load %arg10[%c0_57, %c0_58] : memref<8x64xbf16, #tpu.memory_space<vmem>>, vector<8x64xbf16>
      tpu.vector_store %arg10[%c0_57, %c0_58], %104 {strides = array<i32>} : memref<8x64xbf16, #tpu.memory_space<vmem>>, vector<8x64xbf16>,
    } else {
    }
    %c8_i32 = arith.constant 8 : i32
    %3 = arith.muli %arg1, %c8_i32 : i32
    %4 = tpu.assume_multiple %3, 8 : i32
    %c0 = arith.constant 0 : index
    %5 = arith.index_cast %4 : i32 to index
    %c0_1 = arith.constant 0 : index
    %6 = vector.load %arg2[%c0, %5, %c0_1] : memref<1x8x32xf32, #tpu.memory_space<vmem>>, vector<1x8x32xf32>
    %7 = vector.shape_cast %6 : vector<1x8x32xf32> to vector<8x32xf32>
    %8 = arith.truncf %7 : vector<8x32xf32> to vector<8x32xbf16>
    %c0_2 = arith.constant 0 : index
    %c0_3 = arith.constant 0 : index
    %9 = vector.load %arg3[%c0_2, %c0_3] : memref<32x32xbf16, #tpu.memory_space<vmem>>, vector<32x32xbf16>
    %cst = arith.constant dense<0.000000e+00> : vector<8x32xf32>
    %10 = tpu.matmul %8, %9, %cst {dimension_numbers = #tpu.dot_dimension_numbers<[1], [0], [0], [1], [0, 0, 1, 1], [], []>} : vector<8x32xbf16>, vector<32x32xbf16>, vector<8x32xf32> -> vector<8x32xf32>
    %c0_4 = arith.constant 0 : index
    %c0_5 = arith.constant 0 : index
    %11 = vector.load %arg4[%c0_4, %c0_5] : memref<1x32xf32, #tpu.memory_space<vmem>>, vector<1x32xf32>
    %12 = vector.broadcast %11 : vector<1x32xf32> to vector<8x32xf32>
    %13 = arith.addf %10, %12 : vector<8x32xf32>
    %14 = arith.truncf %13 : vector<8x32xf32> to vector<8x32xbf16>
    %15 = vector.extract_strided_slice %14 {offsets = [0, 0], sizes = [8, 8], strides = [1, 1]} : vector<8x32xbf16> to vector<8x8xbf16>
    %c0_6 = arith.constant 0 : index
    %c0_7 = arith.constant 0 : index
    %16 = vector.load %arg10[%c0_6, %c0_7] : memref<8x64xbf16, #tpu.memory_space<vmem>>, vector<8x8xbf16>
    %c0_8 = arith.constant 0 : index
    %c32 = arith.constant 32 : index
    %17 = vector.load %arg10[%c0_8, %c32] : memref<8x64xbf16, #tpu.memory_space<vmem>>, vector<8x8xbf16>
    %cst_9 = arith.constant dense<0.000000e+00> : vector<8x8xf32>
    %18 = tpu.matmul %15, %16, %cst_9 {dimension_numbers = #tpu.dot_dimension_numbers<[1], [1], [0], [0], [0, 0, 1, 0], [], []>} : vector<8x8xbf16>, vector<8x8xbf16>, vector<8x8xf32> -> vector<8x8xf32>
    %cst_10 = arith.constant dense<0xFF800000> : vector<8xf32>
    %19 = vector.multi_reduction <maximumf>, %18, %cst_10 [1] : vector<8x8xf32> to vector<8xf32>
    %20 = vector.shape_cast %19 : vector<8xf32> to vector<8x1xf32>
    %21 = vector.broadcast %20 : vector<8x1xf32> to vector<8x8xf32>
    %22 = arith.subf %18, %21 : vector<8x8xf32>
    %23 = math.exp %22 : vector<8x8xf32>
    %cst_11 = arith.constant dense<0.000000e+00> : vector<8xf32>
    %24 = vector.multi_reduction <add>, %23, %cst_11 [1] : vector<8x8xf32> to vector<8xf32>
    %25 = vector.shape_cast %24 : vector<8xf32> to vector<8x1xf32>
    %26 = tpu.reciprocal %25 {approx = true} : vector<8x1xf32> -> vector<8x1xf32>
    %27 = vector.broadcast %26 : vector<8x1xf32> to vector<8x8xf32>
    %28 = arith.mulf %23, %27 : vector<8x8xf32>
    %29 = arith.truncf %28 : vector<8x8xf32> to vector<8x8xbf16>
    %cst_12 = arith.constant dense<0.000000e+00> : vector<8x8xf32>
    %30 = tpu.matmul %29, %17, %cst_12 {dimension_numbers = #tpu.dot_dimension_numbers<[1], [0], [0], [1], [0, 0, 1, 1], [], []>} : vector<8x8xbf16>, vector<8x8xbf16>, vector<8x8xf32> -> vector<8x8xf32>
    %31 = arith.truncf %30 : vector<8x8xf32> to vector<8x8xbf16>
    %c0_13 = arith.constant 0 : index
    %c0_14 = arith.constant 0 : index
    %32 = vector.load %arg11[%c0_13, %c0_14] : memref<8x32xbf16, #tpu.memory_space<vmem>>, vector<8x8xbf16>
    tpu.vector_store %arg11[%c0_13, %c0_14], %31 {strides = array<i32>} : memref<8x32xbf16, #tpu.memory_space<vmem>>, vector<8x8xbf16>,
    %33 = vector.extract_strided_slice %14 {offsets = [0, 8], sizes = [8, 8], strides = [1, 1]} : vector<8x32xbf16> to vector<8x8xbf16>
    %c0_15 = arith.constant 0 : index
    %c8 = arith.constant 8 : index
    %34 = vector.load %arg10[%c0_15, %c8] : memref<8x64xbf16, #tpu.memory_space<vmem>>, vector<8x8xbf16>
    %c0_16 = arith.constant 0 : index
    %c40 = arith.constant 40 : index
    %35 = vector.load %arg10[%c0_16, %c40] : memref<8x64xbf16, #tpu.memory_space<vmem>>, vector<8x8xbf16>
    %cst_17 = arith.constant dense<0.000000e+00> : vector<8x8xf32>
    %36 = tpu.matmul %33, %34, %cst_17 {dimension_numbers = #tpu.dot_dimension_numbers<[1], [1], [0], [0], [0, 0, 1, 0], [], []>} : vector<8x8xbf16>, vector<8x8xbf16>, vector<8x8xf32> -> vector<8x8xf32>
    %cst_18 = arith.constant dense<0xFF800000> : vector<8xf32>
    %37 = vector.multi_reduction <maximumf>, %36, %cst_18 [1] : vector<8x8xf32> to vector<8xf32>
    %38 = vector.shape_cast %37 : vector<8xf32> to vector<8x1xf32>
    %39 = vector.broadcast %38 : vector<8x1xf32> to vector<8x8xf32>
    %40 = arith.subf %36, %39 : vector<8x8xf32>
    %41 = math.exp %40 : vector<8x8xf32>
    %cst_19 = arith.constant dense<0.000000e+00> : vector<8xf32>
    %42 = vector.multi_reduction <add>, %41, %cst_19 [1] : vector<8x8xf32> to vector<8xf32>
    %43 = vector.shape_cast %42 : vector<8xf32> to vector<8x1xf32>
    %44 = tpu.reciprocal %43 {approx = true} : vector<8x1xf32> -> vector<8x1xf32>
    %45 = vector.broadcast %44 : vector<8x1xf32> to vector<8x8xf32>
    %46 = arith.mulf %41, %45 : vector<8x8xf32>
    %47 = arith.truncf %46 : vector<8x8xf32> to vector<8x8xbf16>
    %cst_20 = arith.constant dense<0.000000e+00> : vector<8x8xf32>
    %48 = tpu.matmul %47, %35, %cst_20 {dimension_numbers = #tpu.dot_dimension_numbers<[1], [0], [0], [1], [0, 0, 1, 1], [], []>} : vector<8x8xbf16>, vector<8x8xbf16>, vector<8x8xf32> -> vector<8x8xf32>
    %49 = arith.truncf %48 : vector<8x8xf32> to vector<8x8xbf16>
    %c0_21 = arith.constant 0 : index
    %c8_22 = arith.constant 8 : index
    %50 = vector.load %arg11[%c0_21, %c8_22] : memref<8x32xbf16, #tpu.memory_space<vmem>>, vector<8x8xbf16>
    tpu.vector_store %arg11[%c0_21, %c8_22], %49 {strides = array<i32>} : memref<8x32xbf16, #tpu.memory_space<vmem>>, vector<8x8xbf16>,
    %51 = vector.extract_strided_slice %14 {offsets = [0, 16], sizes = [8, 8], strides = [1, 1]} : vector<8x32xbf16> to vector<8x8xbf16>
    %c0_23 = arith.constant 0 : index
    %c16 = arith.constant 16 : index
    %52 = vector.load %arg10[%c0_23, %c16] : memref<8x64xbf16, #tpu.memory_space<vmem>>, vector<8x8xbf16>
    %c0_24 = arith.constant 0 : index
    %c48 = arith.constant 48 : index
    %53 = vector.load %arg10[%c0_24, %c48] : memref<8x64xbf16, #tpu.memory_space<vmem>>, vector<8x8xbf16>
    %cst_25 = arith.constant dense<0.000000e+00> : vector<8x8xf32>
    %54 = tpu.matmul %51, %52, %cst_25 {dimension_numbers = #tpu.dot_dimension_numbers<[1], [1], [0], [0], [0, 0, 1, 0], [], []>} : vector<8x8xbf16>, vector<8x8xbf16>, vector<8x8xf32> -> vector<8x8xf32>
    %cst_26 = arith.constant dense<0xFF800000> : vector<8xf32>
    %55 = vector.multi_reduction <maximumf>, %54, %cst_26 [1] : vector<8x8xf32> to vector<8xf32>
    %56 = vector.shape_cast %55 : vector<8xf32> to vector<8x1xf32>
    %57 = vector.broadcast %56 : vector<8x1xf32> to vector<8x8xf32>
    %58 = arith.subf %54, %57 : vector<8x8xf32>
    %59 = math.exp %58 : vector<8x8xf32>
    %cst_27 = arith.constant dense<0.000000e+00> : vector<8xf32>
    %60 = vector.multi_reduction <add>, %59, %cst_27 [1] : vector<8x8xf32> to vector<8xf32>
    %61 = vector.shape_cast %60 : vector<8xf32> to vector<8x1xf32>
    %62 = tpu.reciprocal %61 {approx = true} : vector<8x1xf32> -> vector<8x1xf32>
    %63 = vector.broadcast %62 : vector<8x1xf32> to vector<8x8xf32>
    %64 = arith.mulf %59, %63 : vector<8x8xf32>
    %65 = arith.truncf %64 : vector<8x8xf32> to vector<8x8xbf16>
    %cst_28 = arith.constant dense<0.000000e+00> : vector<8x8xf32>
    %66 = tpu.matmul %65, %53, %cst_28 {dimension_numbers = #tpu.dot_dimension_numbers<[1], [0], [0], [1], [0, 0, 1, 1], [], []>} : vector<8x8xbf16>, vector<8x8xbf16>, vector<8x8xf32> -> vector<8x8xf32>
    %67 = arith.truncf %66 : vector<8x8xf32> to vector<8x8xbf16>
    %c0_29 = arith.constant 0 : index
    %c16_30 = arith.constant 16 : index
    %68 = vector.load %arg11[%c0_29, %c16_30] : memref<8x32xbf16, #tpu.memory_space<vmem>>, vector<8x8xbf16>
    tpu.vector_store %arg11[%c0_29, %c16_30], %67 {strides = array<i32>} : memref<8x32xbf16, #tpu.memory_space<vmem>>, vector<8x8xbf16>,
    %69 = vector.extract_strided_slice %14 {offsets = [0, 24], sizes = [8, 8], strides = [1, 1]} : vector<8x32xbf16> to vector<8x8xbf16>
    %c0_31 = arith.constant 0 : index
    %c24 = arith.constant 24 : index
    %70 = vector.load %arg10[%c0_31, %c24] : memref<8x64xbf16, #tpu.memory_space<vmem>>, vector<8x8xbf16>
    %c0_32 = arith.constant 0 : index
    %c56 = arith.constant 56 : index
    %71 = vector.load %arg10[%c0_32, %c56] : memref<8x64xbf16, #tpu.memory_space<vmem>>, vector<8x8xbf16>
    %cst_33 = arith.constant dense<0.000000e+00> : vector<8x8xf32>
    %72 = tpu.matmul %69, %70, %cst_33 {dimension_numbers = #tpu.dot_dimension_numbers<[1], [1], [0], [0], [0, 0, 1, 0], [], []>} : vector<8x8xbf16>, vector<8x8xbf16>, vector<8x8xf32> -> vector<8x8xf32>
    %cst_34 = arith.constant dense<0xFF800000> : vector<8xf32>
    %73 = vector.multi_reduction <maximumf>, %72, %cst_34 [1] : vector<8x8xf32> to vector<8xf32>
    %74 = vector.shape_cast %73 : vector<8xf32> to vector<8x1xf32>
    %75 = vector.broadcast %74 : vector<8x1xf32> to vector<8x8xf32>
    %76 = arith.subf %72, %75 : vector<8x8xf32>
    %77 = math.exp %76 : vector<8x8xf32>
    %cst_35 = arith.constant dense<0.000000e+00> : vector<8xf32>
    %78 = vector.multi_reduction <add>, %77, %cst_35 [1] : vector<8x8xf32> to vector<8xf32>
    %79 = vector.shape_cast %78 : vector<8xf32> to vector<8x1xf32>
    %80 = tpu.reciprocal %79 {approx = true} : vector<8x1xf32> -> vector<8x1xf32>
    %81 = vector.broadcast %80 : vector<8x1xf32> to vector<8x8xf32>
    %82 = arith.mulf %77, %81 : vector<8x8xf32>
    %83 = arith.truncf %82 : vector<8x8xf32> to vector<8x8xbf16>
    %cst_36 = arith.constant dense<0.000000e+00> : vector<8x8xf32>
    %84 = tpu.matmul %83, %71, %cst_36 {dimension_numbers = #tpu.dot_dimension_numbers<[1], [0], [0], [1], [0, 0, 1, 1], [], []>} : vector<8x8xbf16>, vector<8x8xbf16>, vector<8x8xf32> -> vector<8x8xf32>
    %85 = arith.truncf %84 : vector<8x8xf32> to vector<8x8xbf16>
    %c0_37 = arith.constant 0 : index
    %c24_38 = arith.constant 24 : index
    %86 = vector.load %arg11[%c0_37, %c24_38] : memref<8x32xbf16, #tpu.memory_space<vmem>>, vector<8x8xbf16>
    tpu.vector_store %arg11[%c0_37, %c24_38], %85 {strides = array<i32>} : memref<8x32xbf16, #tpu.memory_space<vmem>>, vector<8x8xbf16>,
    %c0_39 = arith.constant 0 : index
    %c0_40 = arith.constant 0 : index
    %87 = vector.load %arg11[%c0_39, %c0_40] : memref<8x32xbf16, #tpu.memory_space<vmem>>, vector<8x32xbf16>
    %c0_41 = arith.constant 0 : index
    %c0_42 = arith.constant 0 : index
    %88 = vector.load %arg7[%c0_41, %c0_42] : memref<32x128xbf16, #tpu.memory_space<vmem>>, vector<32x128xbf16>
    %cst_43 = arith.constant dense<0.000000e+00> : vector<8x128xf32>
    %89 = tpu.matmul %87, %88, %cst_43 {dimension_numbers = #tpu.dot_dimension_numbers<[1], [0], [0], [1], [0, 0, 1, 1], [], []>} : vector<8x32xbf16>, vector<32x128xbf16>, vector<8x128xf32> -> vector<8x128xf32>
    %c0_44 = arith.constant 0 : index
    %c0_45 = arith.constant 0 : index
    %90 = vector.load %arg8[%c0_44, %c0_45] : memref<1x128xf32, #tpu.memory_space<vmem>>, vector<1x128xf32>
    %91 = vector.broadcast %90 : vector<1x128xf32> to vector<8x128xf32>
    %92 = arith.addf %89, %91 : vector<8x128xf32>
    %c0_46 = arith.constant 0 : index
    %c0_47 = arith.constant 0 : index
    %c0_48 = arith.constant 0 : index
    %93 = vector.load %arg9[%c0_46, %c0_47, %c0_48] : memref<1x8x128xf32, #tpu.memory_space<vmem>>, vector<1x8x128xf32>
    %94 = vector.shape_cast %93 : vector<1x8x128xf32> to vector<8x128xf32>
    %95 = vector.shape_cast %92 : vector<8x128xf32> to vector<1x8x128xf32>
    tpu.vector_store %arg9[%c0_46, %c0_47, %c0_48], %95 {strides = array<i32>} : memref<1x8x128xf32, #tpu.memory_space<vmem>>, vector<1x8x128xf32>,
    return
  }
  func.func @transform_0(%arg0: i32, %arg1: i32) -> (i32, i32, i32) {
    %c0_i32 = arith.constant 0 : i32
    %c0_i32_0 = arith.constant 0 : i32
    %c0_i32_1 = arith.constant 0 : i32
    return %arg0, %c0_i32, %c0_i32_0 : i32, i32, i32
  }
  func.func @transform_1(%arg0: i32, %arg1: i32) -> (i32, i32) {
    %c0_i32 = arith.constant 0 : i32
    %c0_i32_0 = arith.constant 0 : i32
    %c0_i32_1 = arith.constant 0 : i32
    return %c0_i32, %c0_i32_0 : i32, i32
  }
  func.func @transform_2(%arg0: i32, %arg1: i32) -> (i32, i32) {
    %c0_i32 = arith.constant 0 : i32
    %c0_i32_0 = arith.constant 0 : i32
    %c0_i32_1 = arith.constant 0 : i32
    return %c0_i32, %c0_i32_0 : i32, i32
  }
  func.func @transform_3(%arg0: i32, %arg1: i32) -> (i32, i32) {
    %c0_i32 = arith.constant 0 : i32
    %c0_i32_0 = arith.constant 0 : i32
    %c0_i32_1 = arith.constant 0 : i32
    return %c0_i32, %c0_i32_0 : i32, i32
  }
  func.func @transform_4(%arg0: i32, %arg1: i32) -> (i32, i32) {
    %c0_i32 = arith.constant 0 : i32
    %c0_i32_0 = arith.constant 0 : i32
    %c0_i32_1 = arith.constant 0 : i32
    return %c0_i32, %c0_i32_0 : i32, i32
  }
  func.func @transform_5(%arg0: i32, %arg1: i32) -> (i32, i32) {
    %c0_i32 = arith.constant 0 : i32
    %c0_i32_0 = arith.constant 0 : i32
    %c0_i32_1 = arith.constant 0 : i32
    return %c0_i32, %c0_i32_0 : i32, i32
  }
  func.func @transform_6(%arg0: i32, %arg1: i32) -> (i32, i32) {
    %c0_i32 = arith.constant 0 : i32
    %c0_i32_0 = arith.constant 0 : i32
    %c0_i32_1 = arith.constant 0 : i32
    return %c0_i32, %c0_i32_0 : i32, i32
  }
  func.func @transform_7(%arg0: i32, %arg1: i32) -> (i32, i32, i32) {
    %c0_i32 = arith.constant 0 : i32
    %c0_i32_0 = arith.constant 0 : i32
    return %arg0, %arg1, %c0_i32 : i32, i32, i32
  }
}

module attributes {stable_mosaic.version = 11 : i64} {
  func.func @_mhsa_kernel(%arg0: i32, %arg1: i32, %arg2: memref<1x8x32xf32, #tpu.memory_space<vmem>>, %arg3: memref<32x32xbf16, #tpu.memory_space<vmem>>, %arg4: memref<1x32xf32, #tpu.memory_space<vmem>>, %arg5: memref<32x64xbf16, #tpu.memory_space<vmem>>, %arg6: memref<1x64xf32, #tpu.memory_space<vmem>>, %arg7: memref<32x128xbf16, #tpu.memory_space<vmem>>, %arg8: memref<1x128xf32, #tpu.memory_space<vmem>>, %arg9: memref<1x8x128xf32, #tpu.memory_space<vmem>>, %arg10: memref<8x64xbf16, #tpu.memory_space<vmem>>, %arg11: memref<8x32xbf16, #tpu.memory_space<vmem>>) attributes {dimension_semantics = [#tpu.dimension_semantics<parallel>, #tpu.dimension_semantics<arbitrary>], iteration_bounds = array<i64: 2, 1>, scalar_prefetch = 0 : i64, scratch_operands = 2 : i64, tpu.core_type = #tpu.core_type<tc>, window_params = [{transform_indices = @transform_0, window_bounds = array<i64: 1, 8, 32>}, {pipeline_mode = #tpu.pipeline_mode<synchronous>, transform_indices = @transform_1, window_bounds = array<i64: 32, 32>}, {pipeline_mode = #tpu.pipeline_mode<synchronous>, transform_indices = @transform_2, window_bounds = array<i64: 1, 32>}, {pipeline_mode = #tpu.pipeline_mode<synchronous>, transform_indices = @transform_3, window_bounds = array<i64: 32, 64>}, {pipeline_mode = #tpu.pipeline_mode<synchronous>, transform_indices = @transform_4, window_bounds = array<i64: 1, 64>}, {pipeline_mode = #tpu.pipeline_mode<synchronous>, transform_indices = @transform_5, window_bounds = array<i64: 32, 128>}, {pipeline_mode = #tpu.pipeline_mode<synchronous>, transform_indices = @transform_6, window_bounds = array<i64: 1, 128>}, {transform_indices = @transform_7, window_bounds = array<i64: 1, 8, 128>}]} {
    %c0_i32 = arith.constant 0 : i32
    %0 = arith.cmpi eq, %arg1, %c0_i32 : i32
    %1 = arith.extui %0 : i1 to i32
    %c0_i32_0 = arith.constant 0 : i32
    %2 = arith.cmpi ne, %1, %c0_i32_0 : i32
    scf.if %2 {
      %c0_49 = arith.constant 0 : index
      %c0_50 = arith.constant 0 : index
      %c0_51 = arith.constant 0 : index
      %96 = vector.load %arg2[%c0_49, %c0_50, %c0_51] : memref<1x8x32xf32, #tpu.memory_space<vmem>>, vector<1x8x32xf32>
      %97 = vector.shape_cast %96 : vector<1x8x32xf32> to vector<8x32xf32>
      %98 = arith.truncf %97 : vector<8x32xf32> to vector<8x32xbf16>
      %c0_52 = arith.constant 0 : index
      %c0_53 = arith.constant 0 : index
      %99 = vector.load %arg5[%c0_52, %c0_53] : memref<32x64xbf16, #tpu.memory_space<vmem>>, vector<32x64xbf16>
      %cst_54 = arith.constant dense<0.000000e+00> : vector<8x64xf32>
      %100 = tpu.matmul %98, %99, %cst_54 {dimension_numbers = #tpu.dot_dimension_numbers<[1], [0], [0], [1], [0, 0, 1, 1], [], []>} : vector<8x32xbf16>, vector<32x64xbf16>, vector<8x64xf32> -> vector<8x64xf32>
      %c0_55 = arith.constant 0 : index
      %c0_56 = arith.constant 0 : index
      %101 = vector.load %arg6[%c0_55, %c0_56] : memref<1x64xf32, #tpu.memory_space<vmem>>, vector<1x64xf32>
      %102 = vector.broadcast %101 : vector<1x64xf32> to vector<8x64xf32>
      %103 = arith.addf %100, %102 : vector<8x64xf32>
      %104 = arith.truncf %103 : vector<8x64xf32> to vector<8x64xbf16>
      %c0_57 = arith.constant 0 : index
      %c0_58 = arith.constant 0 : index
      %105 = vector.load %arg10[%c0_57, %c0_58] : memref<8x64xbf16, #tpu.memory_space<vmem>>, vector<8x64xbf16>
      tpu.vector_store %arg10[%c0_57, %c0_58], %104 {strides = array<i32>} : memref<8x64xbf16, #tpu.memory_space<vmem>>, vector<8x64xbf16>,
    } else {
    }
    %c8_i32 = arith.constant 8 : i32
    %3 = arith.muli %arg1, %c8_i32 : i32
    %4 = tpu.assume_multiple %3, 8 : i32
    %c0 = arith.constant 0 : index
    %5 = arith.index_cast %4 : i32 to index
    %c0_1 = arith.constant 0 : index
    %6 = vector.load %arg2[%c0, %5, %c0_1] : memref<1x8x32xf32, #tpu.memory_space<vmem>>, vector<1x8x32xf32>
    %7 = vector.shape_cast %6 : vector<1x8x32xf32> to vector<8x32xf32>
    %8 = arith.truncf %7 : vector<8x32xf32> to vector<8x32xbf16>
    %c0_2 = arith.constant 0 : index
    %c0_3 = arith.constant 0 : index
    %9 = vector.load %arg3[%c0_2, %c0_3] : memref<32x32xbf16, #tpu.memory_space<vmem>>, vector<32x32xbf16>
    %cst = arith.constant dense<0.000000e+00> : vector<8x32xf32>
    %10 = tpu.matmul %8, %9, %cst {dimension_numbers = #tpu.dot_dimension_numbers<[1], [0], [0], [1], [0, 0, 1, 1], [], []>} : vector<8x32xbf16>, vector<32x32xbf16>, vector<8x32xf32> -> vector<8x32xf32>
    %c0_4 = arith.constant 0 : index
    %c0_5 = arith.constant 0 : index
    %11 = vector.load %arg4[%c0_4, %c0_5] : memref<1x32xf32, #tpu.memory_space<vmem>>, vector<1x32xf32>
    %12 = vector.broadcast %11 : vector<1x32xf32> to vector<8x32xf32>
    %13 = arith.addf %10, %12 : vector<8x32xf32>
    %14 = arith.truncf %13 : vector<8x32xf32> to vector<8x32xbf16>
    %15 = vector.extract_strided_slice %14 {offsets = [0, 0], sizes = [8, 8], strides = [1, 1]} : vector<8x32xbf16> to vector<8x8xbf16>
    %c0_6 = arith.constant 0 : index
    %c0_7 = arith.constant 0 : index
    %16 = vector.load %arg10[%c0_6, %c0_7] : memref<8x64xbf16, #tpu.memory_space<vmem>>, vector<8x8xbf16>
    %c0_8 = arith.constant 0 : index
    %c32 = arith.constant 32 : index
    %17 = vector.load %arg10[%c0_8, %c32] : memref<8x64xbf16, #tpu.memory_space<vmem>>, vector<8x8xbf16>
    %cst_9 = arith.constant dense<0.000000e+00> : vector<8x8xf32>
    %18 = tpu.matmul %15, %16, %cst_9 {dimension_numbers = #tpu.dot_dimension_numbers<[1], [1], [0], [0], [0, 0, 1, 0], [], []>} : vector<8x8xbf16>, vector<8x8xbf16>, vector<8x8xf32> -> vector<8x8xf32>
    %cst_10 = arith.constant dense<0xFF800000> : vector<8xf32>
    %19 = vector.multi_reduction <maximumf>, %18, %cst_10 [1] : vector<8x8xf32> to vector<8xf32>
    %20 = vector.shape_cast %19 : vector<8xf32> to vector<8x1xf32>
    %21 = vector.broadcast %20 : vector<8x1xf32> to vector<8x8xf32>
    %22 = arith.subf %18, %21 : vector<8x8xf32>
    %23 = math.exp %22 : vector<8x8xf32>
    %cst_11 = arith.constant dense<0.000000e+00> : vector<8xf32>
    %24 = vector.multi_reduction <add>, %23, %cst_11 [1] : vector<8x8xf32> to vector<8xf32>
    %25 = vector.shape_cast %24 : vector<8xf32> to vector<8x1xf32>
    %26 = tpu.reciprocal %25 {approx = true} : vector<8x1xf32> -> vector<8x1xf32>
    %27 = vector.broadcast %26 : vector<8x1xf32> to vector<8x8xf32>
    %28 = arith.mulf %23, %27 : vector<8x8xf32>
    %29 = arith.truncf %28 : vector<8x8xf32> to vector<8x8xbf16>
    %cst_12 = arith.constant dense<0.000000e+00> : vector<8x8xf32>
    %30 = tpu.matmul %29, %17, %cst_12 {dimension_numbers = #tpu.dot_dimension_numbers<[1], [0], [0], [1], [0, 0, 1, 1], [], []>} : vector<8x8xbf16>, vector<8x8xbf16>, vector<8x8xf32> -> vector<8x8xf32>
    %31 = arith.truncf %30 : vector<8x8xf32> to vector<8x8xbf16>
    %c0_13 = arith.constant 0 : index
    %c0_14 = arith.constant 0 : index
    %32 = vector.load %arg11[%c0_13, %c0_14] : memref<8x32xbf16, #tpu.memory_space<vmem>>, vector<8x8xbf16>
    tpu.vector_store %arg11[%c0_13, %c0_14], %31 {strides = array<i32>} : memref<8x32xbf16, #tpu.memory_space<vmem>>, vector<8x8xbf16>,
    %33 = vector.extract_strided_slice %14 {offsets = [0, 8], sizes = [8, 8], strides = [1, 1]} : vector<8x32xbf16> to vector<8x8xbf16>
    %c0_15 = arith.constant 0 : index
    %c8 = arith.constant 8 : index
    %34 = vector.load %arg10[%c0_15, %c8] : memref<8x64xbf16, #tpu.memory_space<vmem>>, vector<8x8xbf16>
    %c0_16 = arith.constant 0 : index
    %c40 = arith.constant 40 : index
    %35 = vector.load %arg10[%c0_16, %c40] : memref<8x64xbf16, #tpu.memory_space<vmem>>, vector<8x8xbf16>
    %cst_17 = arith.constant dense<0.000000e+00> : vector<8x8xf32>
    %36 = tpu.matmul %33, %34, %cst_17 {dimension_numbers = #tpu.dot_dimension_numbers<[1], [1], [0], [0], [0, 0, 1, 0], [], []>} : vector<8x8xbf16>, vector<8x8xbf16>, vector<8x8xf32> -> vector<8x8xf32>
    %cst_18 = arith.constant dense<0xFF800000> : vector<8xf32>
    %37 = vector.multi_reduction <maximumf>, %36, %cst_18 [1] : vector<8x8xf32> to vector<8xf32>
    %38 = vector.shape_cast %37 : vector<8xf32> to vector<8x1xf32>
    %39 = vector.broadcast %38 : vector<8x1xf32> to vector<8x8xf32>
    %40 = arith.subf %36, %39 : vector<8x8xf32>
    %41 = math.exp %40 : vector<8x8xf32>
    %cst_19 = arith.constant dense<0.000000e+00> : vector<8xf32>
    %42 = vector.multi_reduction <add>, %41, %cst_19 [1] : vector<8x8xf32> to vector<8xf32>
    %43 = vector.shape_cast %42 : vector<8xf32> to vector<8x1xf32>
    %44 = tpu.reciprocal %43 {approx = true} : vector<8x1xf32> -> vector<8x1xf32>
    %45 = vector.broadcast %44 : vector<8x1xf32> to vector<8x8xf32>
    %46 = arith.mulf %41, %45 : vector<8x8xf32>
    %47 = arith.truncf %46 : vector<8x8xf32> to vector<8x8xbf16>
    %cst_20 = arith.constant dense<0.000000e+00> : vector<8x8xf32>
    %48 = tpu.matmul %47, %35, %cst_20 {dimension_numbers = #tpu.dot_dimension_numbers<[1], [0], [0], [1], [0, 0, 1, 1], [], []>} : vector<8x8xbf16>, vector<8x8xbf16>, vector<8x8xf32> -> vector<8x8xf32>
    %49 = arith.truncf %48 : vector<8x8xf32> to vector<8x8xbf16>
    %c0_21 = arith.constant 0 : index
    %c8_22 = arith.constant 8 : index
    %50 = vector.load %arg11[%c0_21, %c8_22] : memref<8x32xbf16, #tpu.memory_space<vmem>>, vector<8x8xbf16>
    tpu.vector_store %arg11[%c0_21, %c8_22], %49 {strides = array<i32>} : memref<8x32xbf16, #tpu.memory_space<vmem>>, vector<8x8xbf16>,
    %51 = vector.extract_strided_slice %14 {offsets = [0, 16], sizes = [8, 8], strides = [1, 1]} : vector<8x32xbf16> to vector<8x8xbf16>
    %c0_23 = arith.constant 0 : index
    %c16 = arith.constant 16 : index
    %52 = vector.load %arg10[%c0_23, %c16] : memref<8x64xbf16, #tpu.memory_space<vmem>>, vector<8x8xbf16>
    %c0_24 = arith.constant 0 : index
    %c48 = arith.constant 48 : index
    %53 = vector.load %arg10[%c0_24, %c48] : memref<8x64xbf16, #tpu.memory_space<vmem>>, vector<8x8xbf16>
    %cst_25 = arith.constant dense<0.000000e+00> : vector<8x8xf32>
    %54 = tpu.matmul %51, %52, %cst_25 {dimension_numbers = #tpu.dot_dimension_numbers<[1], [1], [0], [0], [0, 0, 1, 0], [], []>} : vector<8x8xbf16>, vector<8x8xbf16>, vector<8x8xf32> -> vector<8x8xf32>
    %cst_26 = arith.constant dense<0xFF800000> : vector<8xf32>
    %55 = vector.multi_reduction <maximumf>, %54, %cst_26 [1] : vector<8x8xf32> to vector<8xf32>
    %56 = vector.shape_cast %55 : vector<8xf32> to vector<8x1xf32>
    %57 = vector.broadcast %56 : vector<8x1xf32> to vector<8x8xf32>
    %58 = arith.subf %54, %57 : vector<8x8xf32>
    %59 = math.exp %58 : vector<8x8xf32>
    %cst_27 = arith.constant dense<0.000000e+00> : vector<8xf32>
    %60 = vector.multi_reduction <add>, %59, %cst_27 [1] : vector<8x8xf32> to vector<8xf32>
    %61 = vector.shape_cast %60 : vector<8xf32> to vector<8x1xf32>
    %62 = tpu.reciprocal %61 {approx = true} : vector<8x1xf32> -> vector<8x1xf32>
    %63 = vector.broadcast %62 : vector<8x1xf32> to vector<8x8xf32>
    %64 = arith.mulf %59, %63 : vector<8x8xf32>
    %65 = arith.truncf %64 : vector<8x8xf32> to vector<8x8xbf16>
    %cst_28 = arith.constant dense<0.000000e+00> : vector<8x8xf32>
    %66 = tpu.matmul %65, %53, %cst_28 {dimension_numbers = #tpu.dot_dimension_numbers<[1], [0], [0], [1], [0, 0, 1, 1], [], []>} : vector<8x8xbf16>, vector<8x8xbf16>, vector<8x8xf32> -> vector<8x8xf32>
    %67 = arith.truncf %66 : vector<8x8xf32> to vector<8x8xbf16>
    %c0_29 = arith.constant 0 : index
    %c16_30 = arith.constant 16 : index
    %68 = vector.load %arg11[%c0_29, %c16_30] : memref<8x32xbf16, #tpu.memory_space<vmem>>, vector<8x8xbf16>
    tpu.vector_store %arg11[%c0_29, %c16_30], %67 {strides = array<i32>} : memref<8x32xbf16, #tpu.memory_space<vmem>>, vector<8x8xbf16>,
    %69 = vector.extract_strided_slice %14 {offsets = [0, 24], sizes = [8, 8], strides = [1, 1]} : vector<8x32xbf16> to vector<8x8xbf16>
    %c0_31 = arith.constant 0 : index
    %c24 = arith.constant 24 : index
    %70 = vector.load %arg10[%c0_31, %c24] : memref<8x64xbf16, #tpu.memory_space<vmem>>, vector<8x8xbf16>
    %c0_32 = arith.constant 0 : index
    %c56 = arith.constant 56 : index
    %71 = vector.load %arg10[%c0_32, %c56] : memref<8x64xbf16, #tpu.memory_space<vmem>>, vector<8x8xbf16>
    %cst_33 = arith.constant dense<0.000000e+00> : vector<8x8xf32>
    %72 = tpu.matmul %69, %70, %cst_33 {dimension_numbers = #tpu.dot_dimension_numbers<[1], [1], [0], [0], [0, 0, 1, 0], [], []>} : vector<8x8xbf16>, vector<8x8xbf16>, vector<8x8xf32> -> vector<8x8xf32>
    %cst_34 = arith.constant dense<0xFF800000> : vector<8xf32>
    %73 = vector.multi_reduction <maximumf>, %72, %cst_34 [1] : vector<8x8xf32> to vector<8xf32>
    %74 = vector.shape_cast %73 : vector<8xf32> to vector<8x1xf32>
    %75 = vector.broadcast %74 : vector<8x1xf32> to vector<8x8xf32>
    %76 = arith.subf %72, %75 : vector<8x8xf32>
    %77 = math.exp %76 : vector<8x8xf32>
    %cst_35 = arith.constant dense<0.000000e+00> : vector<8xf32>
    %78 = vector.multi_reduction <add>, %77, %cst_35 [1] : vector<8x8xf32> to vector<8xf32>
    %79 = vector.shape_cast %78 : vector<8xf32> to vector<8x1xf32>
    %80 = tpu.reciprocal %79 {approx = true} : vector<8x1xf32> -> vector<8x1xf32>
    %81 = vector.broadcast %80 : vector<8x1xf32> to vector<8x8xf32>
    %82 = arith.mulf %77, %81 : vector<8x8xf32>
    %83 = arith.truncf %82 : vector<8x8xf32> to vector<8x8xbf16>
    %cst_36 = arith.constant dense<0.000000e+00> : vector<8x8xf32>
    %84 = tpu.matmul %83, %71, %cst_36 {dimension_numbers = #tpu.dot_dimension_numbers<[1], [0], [0], [1], [0, 0, 1, 1], [], []>} : vector<8x8xbf16>, vector<8x8xbf16>, vector<8x8xf32> -> vector<8x8xf32>
    %85 = arith.truncf %84 : vector<8x8xf32> to vector<8x8xbf16>
    %c0_37 = arith.constant 0 : index
    %c24_38 = arith.constant 24 : index
    %86 = vector.load %arg11[%c0_37, %c24_38] : memref<8x32xbf16, #tpu.memory_space<vmem>>, vector<8x8xbf16>
    tpu.vector_store %arg11[%c0_37, %c24_38], %85 {strides = array<i32>} : memref<8x32xbf16, #tpu.memory_space<vmem>>, vector<8x8xbf16>,
    %c0_39 = arith.constant 0 : index
    %c0_40 = arith.constant 0 : index
    %87 = vector.load %arg11[%c0_39, %c0_40] : memref<8x32xbf16, #tpu.memory_space<vmem>>, vector<8x32xbf16>
    %c0_41 = arith.constant 0 : index
    %c0_42 = arith.constant 0 : index
    %88 = vector.load %arg7[%c0_41, %c0_42] : memref<32x128xbf16, #tpu.memory_space<vmem>>, vector<32x128xbf16>
    %cst_43 = arith.constant dense<0.000000e+00> : vector<8x128xf32>
    %89 = tpu.matmul %87, %88, %cst_43 {dimension_numbers = #tpu.dot_dimension_numbers<[1], [0], [0], [1], [0, 0, 1, 1], [], []>} : vector<8x32xbf16>, vector<32x128xbf16>, vector<8x128xf32> -> vector<8x128xf32>
    %c0_44 = arith.constant 0 : index
    %c0_45 = arith.constant 0 : index
    %90 = vector.load %arg8[%c0_44, %c0_45] : memref<1x128xf32, #tpu.memory_space<vmem>>, vector<1x128xf32>
    %91 = vector.broadcast %90 : vector<1x128xf32> to vector<8x128xf32>
    %92 = arith.addf %89, %91 : vector<8x128xf32>
    %c0_46 = arith.constant 0 : index
    %c0_47 = arith.constant 0 : index
    %c0_48 = arith.constant 0 : index
    %93 = vector.load %arg9[%c0_46, %c0_47, %c0_48] : memref<1x8x128xf32, #tpu.memory_space<vmem>>, vector<1x8x128xf32>
    %94 = vector.shape_cast %93 : vector<1x8x128xf32> to vector<8x128xf32>
    %95 = vector.shape_cast %92 : vector<8x128xf32> to vector<1x8x128xf32>
    tpu.vector_store %arg9[%c0_46, %c0_47, %c0_48], %95 {strides = array<i32>} : memref<1x8x128xf32, #tpu.memory_space<vmem>>, vector<1x8x128xf32>,
    return
  }
  func.func @transform_0(%arg0: i32, %arg1: i32) -> (i32, i32, i32) {
    %c0_i32 = arith.constant 0 : i32
    %c0_i32_0 = arith.constant 0 : i32
    %c0_i32_1 = arith.constant 0 : i32
    return %arg0, %c0_i32, %c0_i32_0 : i32, i32, i32
  }
  func.func @transform_1(%arg0: i32, %arg1: i32) -> (i32, i32) {
    %c0_i32 = arith.constant 0 : i32
    %c0_i32_0 = arith.constant 0 : i32
    %c0_i32_1 = arith.constant 0 : i32
    return %c0_i32, %c0_i32_0 : i32, i32
  }
  func.func @transform_2(%arg0: i32, %arg1: i32) -> (i32, i32) {
    %c0_i32 = arith.constant 0 : i32
    %c0_i32_0 = arith.constant 0 : i32
    %c0_i32_1 = arith.constant 0 : i32
    return %c0_i32, %c0_i32_0 : i32, i32
  }
  func.func @transform_3(%arg0: i32, %arg1: i32) -> (i32, i32) {
    %c0_i32 = arith.constant 0 : i32
    %c0_i32_0 = arith.constant 0 : i32
    %c0_i32_1 = arith.constant 0 : i32
    return %c0_i32, %c0_i32_0 : i32, i32
  }
  func.func @transform_4(%arg0: i32, %arg1: i32) -> (i32, i32) {
    %c0_i32 = arith.constant 0 : i32
    %c0_i32_0 = arith.constant 0 : i32
    %c0_i32_1 = arith.constant 0 : i32
    return %c0_i32, %c0_i32_0 : i32, i32
  }
  func.func @transform_5(%arg0: i32, %arg1: i32) -> (i32, i32) {
    %c0_i32 = arith.constant 0 : i32
    %c0_i32_0 = arith.constant 0 : i32
    %c0_i32_1 = arith.constant 0 : i32
    return %c0_i32, %c0_i32_0 : i32, i32
  }
  func.func @transform_6(%arg0: i32, %arg1: i32) -> (i32, i32) {
    %c0_i32 = arith.constant 0 : i32
    %c0_i32_0 = arith.constant 0 : i32
    %c0_i32_1 = arith.constant 0 : i32
    return %c0_i32, %c0_i32_0 : i32, i32
  }
  func.func @transform_7(%arg0: i32, %arg1: i32) -> (i32, i32, i32) {
    %c0_i32 = arith.constant 0 : i32
    %c0_i32_0 = arith.constant 0 : i32
    return %arg0, %arg1, %c0_i32 : i32, i32, i32
  }
}

</mosaic_0001>

<bundles_post_ra>
// kernel: tpu_custom_call.1
= control target key start
LH: loop header
LB: loop body
LE: loop exit
PB: predicated region body
PF: predicated region fallthrough
CT: control target
= control target key end

     0   :  { %s1547_s0 = inlined_call_operand.hbm [shape: f32[2,8,32], index: 0, kind: input, shape index: {}]   ;;  %s1548_s1 = inlined_call_operand.hbm [shape: bf16[32,32], index: 1, kind: input, shape index: {}]   ;;  %s1549_s2 = inlined_call_operand.vmem [shape: f32[1,32], index: 2, kind: input, shape index: {}]   ;;  %s1550_s3 = inlined_call_operand.hbm [shape: bf16[32,64], index: 3, kind: input, shape index: {}]   ;;  %s1551_s4 = inlined_call_operand.vmem [shape: f32[1,64], index: 4, kind: input, shape index: {}]   ;;  %s1552_s5 = inlined_call_operand.hbm [shape: bf16[32,128], index: 5, kind: input, shape index: {}]   ;;  %s1553_s6 = inlined_call_operand.vmem [shape: f32[1,128], index: 6, kind: input, shape index: {}]   ;;  %s1554_s7 = inlined_call_operand.hbm [shape: f32[2,8,128], index: 7, kind: output, shape index: {}]  }
   0x1   :  { %1555 = sst [smem:[#allocation17_spill]] %s1548_s1 }
   0x2   :  { %1556 = sst [smem:[#allocation18_spill]] %s1550_s3 }
   0x3   :  { %12 = vsyncpa [#allocation5], 0 }
   0x4   :  { %14 = vsyncpa [#allocation5 + $0x1], 0 }
   0x5   :  { %15 = vsyncpa [#allocation8], 0 }
   0x6   :  { %16 = vsyncpa [#allocation11], 0 }
   0x7   :  { %17 = vsyncpa [#allocation6], 0 }
   0x8   :  { %19 = vsyncpa [#allocation6 + $0x1], 0  ;;  %s1330_s24 = smov 0   ;;  %s1332_s25 = smov 0  }
   0x9   :  { %s1334_s26 = smov 0   ;;  %s1336_s27 = smov 0  }
   0xa   :  { %s1338_s28 = smov 0   ;;  %s1340_s29 = smov 0  }
   0xb LB: > { %s879_s30 = sadd.s32 4294967295, %s1273_s29   ;;  %p881_p0 = scmp.ge.s32.totalorder %s1273_s29, 1  ;;  %s1273_s29 = sphi %s1340_s29, %s25_s29   ;;  %s1269_s28 = sphi %s1338_s28, %s1570_s28   ;;  %s1265_s27 = sphi %s1336_s27, %s1569_s27   ;;  %s1261_s26 = sphi %s1334_s26, %s1568_s26   ;;  %s1257_s25 = sphi %s1332_s25, %s1567_s25   ;;  %s1253_s24 = sphi %s1330_s24, %s1566_s24  }
   0xc   : > { %p1364_p1 = scmp.eq.s32.totalorder %s879_s30, 0  ;;  %p222_p2 = scmp.lt.s32.totalorder %s1273_s29, 3 }
   0xd   : > { %s1558_s1 = sld [smem:[#allocation17_spill]]  ;;  %s1275_s13 = smov [#allocation7]  }
   0xe   : > { %p1372_p3 = pnand %p881_p0, %p222_p2  ;;  %s235_s14 = sshll.u32 %s1275_s13, 4  ;;  %s236_s14 = int_to_ptr.vmem [resolvable:$true] %s235_s14 }
   0xf   : > { %p885_p6 = scmp.ge.s32.totalorder %s1273_s29, 2  ;;  %s1561_s3 = sld [smem:[#allocation18_spill]] }
  0x10   : > { %p955_p4 = pneg %p1372_p3  ;;  %s1276_s19 = smov 64  }
  0x11   : > { %s1277_s20 = smov 4   ;;  %s1278_s21 = smov [#allocation9]  }
  0x12   : > { %p1380_p5 = pnand %p955_p4, %p1364_p1  ;;  %s252_s22 = sshll.u32 %s1278_s21, 4  ;;  %s253_s22 = int_to_ptr.vmem [resolvable:$true] %s252_s22 }
  0x13   : > { %s233_s11 = sshll.u32 %s1558_s1, 4  ;;  %s267_s10 = sshll.u32 %s1552_s5, 4  ;;  %s234_s11 = int_to_ptr.hbm [resolvable:$true] %s233_s11  ;;  %s268_s10 = int_to_ptr.hbm [resolvable:$true] %s267_s10 }
  0x14   : > { %958 = dma.hbm_to_vmem [thread:$0]  (!%p1380_p5), %s234_s11, 256, %s236_s14, [#allocation8], %s1276_s19, %s1276_s19, %s1277_s20  }
  0x15   : > { %s250_s18 = sshll.u32 %s1561_s3, 4  ;;  %s1279_s13 = smov [#allocation10]   ;;  %s251_s18 = int_to_ptr.hbm [resolvable:$true] %s250_s18 }
  0x16   : > { %961 = dma.hbm_to_vmem [thread:$0]  (!%p1380_p5), %s251_s18, 256, %s253_s22, [#allocation8], %s1276_s19, %s1276_s19, %s1277_s20  }
  0x17   : > { %s269_s16 = sshll.u32 %s1279_s13, 4  ;;  %s880_s11 = sadd.s32 4294967294, %s1273_s29   ;;  %s270_s16 = int_to_ptr.vmem [resolvable:$true] %s269_s16 }
  0x18   : > { %964 = dma.hbm_to_vmem [thread:$0]  (!%p1380_p5), %s268_s10, 256, %s270_s16, [#allocation11], %s1276_s19, %s1276_s19, %s1277_s20  }
  0x19   : > { %s37_s14 = sadd.s32 1, %s1269_s28  ;;  %s44_s17 = sadd.s32 1, %s1261_s26 }
  0x1a   : > { %p39_p7 = scmp.ge.s32.totalorder %s37_s14, 2  ;;  %p51_p8 = scmp.ne.s32.totalorder %s1261_s26, %s1257_s25 }
  0x1b   : > { %p52_p9 = scmp.eq.s32.totalorder %s1273_s29, 0  ;;  %p57_p10 = scmp.ne.s32.totalorder %s1257_s25, %s1253_s24 }
  0x1c   : > { %s1572_s14 = smov (%p39_p7, %s37_s14), 0  ;;  %p209_p13 = scmp.eq.s32.totalorder %s879_s30, 1 }
  0x1d   : > { %p1407_p11 = por %p52_p9, %p51_p8  ;;  %p1413_p12 = por %p1364_p1, %p57_p10 }
  0x1e   : > { %s41_s19 = ssub.s32 %s1269_s28, %s1572_s14  ;;  %p215_p2 = scmp.eq.s32.totalorder %s880_s11, 1 }
  0x1f   : > { %p42_p0 = scmp.eq.s32.totalorder %s41_s19, 0  ;;  %p1421_p4 = por %p209_p13, %p51_p8 }
  0x20   : > { %p976_p5 = scmp.lt.s32.totalorder %s1273_s29, 2  ;;  %p1429_p7 = por %p215_p2, %p57_p10 }
  0x21   : > { %s1427_s21 = scalar_select %p42_p0, %s1261_s26, %s44_s17  }
  0x22   : > { %s286_s23 = sand.u32 1, %s1261_s26   ;;  %s887_s10 = sshll.u32 %s1269_s28, 3 }
  0x23   : > { %s886_s9 = sshll.u32 %s286_s23, 3  ;;  %s294_s30 = scalar_lea.hbm %s1547_s0, %s887_s10 }
  0x24   : > { %s290_s19 = scalar_lea.vmem [#allocation4], %s886_s9  ;;  %s296_s1 = sshll.u32 %s294_s30, 4  ;;  %s297_s1 = int_to_ptr.hbm [resolvable:$true] %s296_s1 }
  0x25   : > { %s298_s11 = sshll.u32 %s290_s19, 4  ;;  %p966_p8 = pnand %p976_p5, %p1407_p11  ;;  %s299_s11 = int_to_ptr.vmem [resolvable:$true] %s298_s11 }
  0x26   : > { %s287_s17 = scalar_lea.sflag [#allocation5], %s286_s23  ;;  %307 = sbr.rel (%p1372_p3) target bundleno = 1388 (0x56c), region = 48 }
  0x27   : > { %968 = dma.hbm_to_vmem [thread:$0]  (!%p966_p8), %s297_s1, 128, %s299_s11, %s287_s17  }
  0x28   : > { %s1443_s3 = sand.u32 (!%p1372_p3), 1, %s1257_s25  }
  0x29   : > { %s889_s10 = sshll.u32 (!%p1372_p3), %s1443_s3, 3  ;;  %s310_s9 = scalar_lea.sflag (!%p1372_p3), [#allocation5], %s1443_s3 }
  0x2a   : > { %s313_s13 = scalar_lea.vmem (!%p1372_p3), [#allocation4], %s889_s10 }
  0x2b   : > { %1236 = dma.done.wait (%p1413_p12), %s310_s9, 128  }
  0x2c   : > { %1238 = vsyncadd (%p1413_p12), %s310_s9, 4294967168 }
  0x2d   : > { %1240 = dma.done.wait (%p1364_p1), [#allocation8], 512  }
  0x2e   : > { %1242 = vsyncadd (%p1364_p1), [#allocation8], 4294966784 }
  0x2f   : > { %1244 = dma.done.wait (%p1364_p1), [#allocation11], 256  }
  0x30   : > { %1246 = vsyncadd (%p1364_p1), [#allocation11], 4294967040  ;;  %v934_v0 = vld [vmem:[#allocation9 + $0x8] sm:$0xff]  ;;  %v936_v1 = vld [vmem:[#allocation7 + $0x8] sm:$0xff]  ;;  %vm387_vm0 = vcmask 261120   ;;  %vm405_vm1 = vcmask 519168  }
  0x31   : > { %v933_v2 = vld [vmem:[#allocation9] sm:$0xff]  ;;  %v935_v3 = vld [vmem:[#allocation7] sm:$0xff]  ;;  %397 = vmatpush.bf16.msra.mxu0 %v934_v0  ;;  %441 = vmatpush.bf16.msra.mxu1 %v936_v1  ;;  %v1044_v6 = vld [vmem:[%s1551_s4] ss:$0 sm:$0xff]  ;;  %s1280_s15 = smov 120   ;;  %vm450_vm2 = vcmask 64512  }
  0x32   : > { %v365_v4 = vld [vmem:[%s313_s13] sm:$0xff]  ;;  %v1045_v7 = vld [vmem:[%s1549_s2] ss:$0 sm:$0xff]  ;;  %s1281_s23 = smov 112   ;;  %s1282_s16 = smov 96   ;;  %vm490_vm3 = vcmask 1043456  }
  0x33   : > { %v366_v5 = vpack.c.bf16 %v365_v4, %v365_v4  ;;  %s1283_s30 = smov 104   ;;  %vm508_vm4 = vcmask 60416   ;;  %s1284_s19 = smov 88   ;;  %vm578_vm5 = vcmask 126016   ;;  %vm645_vm6 = vcmask 191616  }
  0x34   : > { %s1285_s11 = smov 80   ;;  %s1286_s17 = smov 72   ;;  %vm712_vm7 = vcmask 257216  }
  0x35   : > { %398 = vmatpush.bf16.msra.mxu0 %v933_v2  ;;  %442 = vmatpush.bf16.msra.mxu1 %v935_v3  ;;  %s1287_s9 = smov 8   ;;  %s1288_s13 = smov 16  }
  0x36   : > { %s1289_s1 = smov 24   ;;  %s930_s12 = sshll.u32 %s1265_s27, 3 }
  0x38   : > { %902 = vmatmul.msk.bf16.vlgmr.msra.gmra.mxu0 %vm387_vm0, %v366_v5  ;;  %911 = vmatmul.msk.bf16.vlgmr.msra.gmra.mxu1 %vm387_vm0, %v366_v5 }
  0xb5   : > { %v400_v8 = vpop.f32.mrf.mxu0  ;;  %v444_v9 = vpop.f32.mrf.mxu1 }
  0xb6   : > { %v401_v10 = vadd.f32 %v1044_v6, %v400_v8  ;;  %v445_v11 = vadd.f32 %v1045_v7, %v444_v9 }
  0xb8   : > { %v404_v12 = vpack.c.bf16 %v401_v10, %v401_v10  ;;  %v448_v13 = vpack.c.bf16 %v445_v11, %v445_v11 }
  0xba   : > { %406 = vst.msk [vmem:[#allocation2] sm:$0xf] %vm405_vm1, %v404_v12  ;;  %v512_v14 = vunpack.c.l.b16 %v448_v13 }
  0xbc   : > { %v513_v15 = vpack.c.b16 %v512_v14, %v512_v14 }
  0xbd   : > { %v402_v16 = vpop.f32.mrf.mxu0  ;;  %v446_v17 = vpop.f32.mrf.mxu1 }
  0xbe   : > { %514 = vrot.lane.b32.xlu2 %v513_v15, %s1280_s15 }
  0xc1   : > { %v449_v18 = vld [vmem:[#allocation2] sm:$0xf] }
  0xc2   : > { %v580_v19 = vld [vmem:[#allocation2] sm:$0xf]  ;;  %v455_v20 = vsel %vm450_vm2, %v449_v18, 0  ;;  %v483_v21 = vunpack.c.l.b16 %v449_v18 }
  0xc3   : > { %v584_v22 = vunpack.c.l.b16 %v580_v19  ;;  %464 = vmatpush.bf16.xpose.msra.mxu2 %v455_v20  ;;  %v510_v25 = vld [vmem:[#allocation2] sm:$0xf] }
  0xc4   : > { %v484_v24 = vpack.c.b16 %v483_v21, %v483_v21  ;;  %v517_v26 = vunpack.c.l.b16 %v510_v25  ;;  %v647_v47 = vld [vmem:[#allocation2] sm:$0xf] }
  0xc5   : > { %v1470_v23 = vpack.c.b16 %v584_v22, %v584_v22  ;;  %v651_v48 = vunpack.c.l.b16 %v647_v47 }
  0xc6   : > { %485 = vrot.lane.b32.xlu1 %v484_v24, %s1282_s16  ;;  %v1474_v27 = vpack.c.b16 %v517_v26, %v517_v26 }
  0xc7   : > { %586 = vrot.lane.b32.xlu2 %v1470_v23, %s1281_s23  ;;  %v652_v49 = vpack.c.b16 %v651_v48, %v651_v48 }
  0xca   : > { %912 = vmatmul.msk.bf16.vlgmr.msra.gmra.mxu2 %vm450_vm2, %v448_v13 }
  0xce   : > { %519 = vrot.lane.b32.xlu1 %v1474_v27, %s1280_s15  ;;  %s764_s15 = scalar_lea.hbm %s1554_s7, %s930_s12  ;;  %s1203_s12 = scalar_lea.hbm %s1554_s7, 16 }
  0xcf   : > { %648 = vrot.lane.b32.xlu2 %v513_v15, %s1283_s30 }
  0xd6   : > { %581 = vrot.lane.b32.xlu1 %v513_v15, %s1281_s23 }
 0x118   : > { %v515_v28 = vpop.permute.xlu2 %514 }
 0x121   : > { %v587_v29 = vpop.permute.xlu2 %586 }
 0x122   : > { %v592_v30 = vsel %vm450_vm2, %v587_v29, 0 }
 0x123   : > { %601 = vmatpush.bf16.xpose.msrb.mxu1 %v592_v30 }
 0x129   : > { %v649_v50 = vpop.permute.xlu2 %648 }
 0x138   : > { %v486_v31 = vpop.permute.xlu1 %485 }
 0x139   : > { %v492_v32 = vsel %vm490_vm3, %v486_v31, 0 }
 0x13a   : > { %501 = vmatpush.bf16.msra.mxu3 %v492_v32 }
 0x140   : > { %v520_v33 = vpop.permute.xlu1 %519 }
 0x141   : > { %v525_v34 = vsel %vm450_vm2, %v520_v33, 0 }
 0x142   : > { %534 = vmatpush.bf16.xpose.msrb.mxu3 %v525_v34 }
 0x148   : > { %v582_v35 = vpop.permute.xlu1 %581 }
 0x149   : > { %916 = vmatmul.msk.bf16.vlgmr.msrb.gmra.mxu1 %vm450_vm2, %v582_v35 }
 0x14d   : > { %v466_v36 = vpop.f32.mrf.mxu2 }
 0x14e   : > { %v470_v37 = vsel %vm450_vm2, %v466_v36, -inf }
 0x14f   : > { %471 = vmax.xlane.f32.xlu0 %v470_v37 }
 0x155   : > { %v468_v38 = vpop.f32.mrf.mxu2 }
 0x1c2   : > { %v472_v39 = vpop.xlane.xlu0 %471 }
 0x1c3   : > { %v473_v40 = vsub.f32 %v466_v36, %v472_v39 }
 0x1c5   : > { %v474_v41 = vmul.f32 1.442695, %v473_v40 }
 0x1c6   : > { %v603_v42 = vpop.f32.mrf.mxu1 }
 0x1c7   : > { %1047 = vpow2.f32 %v474_v41  ;;  %v607_v43 = vsel %vm450_vm2, %v603_v42, -inf }
 0x1c8   : > { %608 = vmax.xlane.f32.xlu2 %v607_v43 }
 0x1cd   : > { %v1048_v44 = vpop.eup %1047 }
 0x1ce   : > { %v605_v45 = vpop.f32.mrf.mxu1  ;;  %v476_v46 = vsel %vm450_vm2, %v1048_v44, 0.0 }
 0x1cf   : > { %477 = vadd.xlane.f32.xlu0 %v476_v46  ;;  %v937_v45 = vld [vmem:[#allocation10] sm:$0xff] }
 0x1e3   : > { %653 = vrot.lane.b32.xlu0 %v652_v49, %s1283_s30  ;;  %s359_s30 = scalar_lea.vmem [#allocation12], %s889_s10 }
 0x23b   : > { %v609_v51 = vpop.xlane.xlu2 %608 }
 0x23c   : > { %v610_v52 = vsub.f32 %v603_v42, %v609_v51 }
 0x23e   : > { %v611_v53 = vmul.f32 1.442695, %v610_v52 }
 0x240   : > { %1049 = vpow2.f32 %v611_v53 }
 0x242   : > { %v478_v54 = vpop.xlane.xlu0 %477 }
 0x243   : > { %1051 = vrcp.f32 %v478_v54 }
 0x246   : > { %v1050_v55 = vpop.eup %1049 }
 0x247   : > { %v613_v56 = vsel %vm450_vm2, %v1050_v55, 0.0 }
 0x248   : > { %614 = vadd.xlane.f32.xlu2 %v613_v56 }
 0x249   : > { %v1052_v57 = vpop.eup %1051 }
 0x24a   : > { %v480_v58 = vmul.f32 %v1052_v57, %v1048_v44  ;;  %v938_v44 = vld [vmem:[#allocation10 + $0x8] sm:$0xff] }
 0x24b   : > { %744 = vmatpush.bf16.msra.mxu1 %v938_v44 }
 0x24c   : > { %v481_v59 = vpack.c.bf16 %v480_v58, %v480_v58 }
 0x24e   : > { %913 = vmatmul.msk.bf16.vlgmr.msra.gmra.mxu3 %vm450_vm2, %v481_v59 }
 0x24f   : > { %745 = vmatpush.bf16.msra.mxu1 %v937_v45 }
 0x255   : > { %v654_v60 = vpop.permute.xlu0 %653 }
 0x256   : > { %v659_v61 = vsel %vm450_vm2, %v654_v60, 0 }
 0x257   : > { %668 = vmatpush.bf16.xpose.msra.mxu3 %v659_v61 }
 0x25e   : > { %914 = vmatmul.msk.bf16.vlgmr.msrb.gmra.mxu3 %vm450_vm2, %v515_v28 }
 0x26e   : > { %918 = vmatmul.msk.bf16.vlgmr.msra.gmra.mxu3 %vm450_vm2, %v649_v50  ;;  %v1046_v50 = vld [vmem:[%s1553_s6] ss:$0 sm:$0xff] }
 0x2bb   : > { %v615_v19 = vpop.xlane.xlu2 %614 }
 0x2d1   : > { %v503_v62 = vpop.f32.mrf.mxu3 }
 0x2d2   : > { %v507_v63 = vpack.c.bf16 %v503_v62, %v503_v62 }
 0x2d4   : > { %509 = vst.msk [vmem:[#allocation3] sm:$0xf] %vm508_vm4, %v507_v63 }
 0x2d9   : > { %v505_v0 = vpop.f32.mrf.mxu3 }
 0x2e1   : > { %v536_v1 = vpop.f32.mrf.mxu3 }
 0x2e2   : > { %v540_v2 = vsel %vm450_vm2, %v536_v1, -inf }
 0x2e3   : > { %541 = vmax.xlane.f32.xlu1 %v540_v2 }
 0x2e9   : > { %v538_v3 = vpop.f32.mrf.mxu3 }
 0x2f1   : > { %v670_v4 = vpop.f32.mrf.mxu3 }
 0x2f2   : > { %v674_v5 = vsel %vm450_vm2, %v670_v4, -inf }
 0x2f3   : > { %675 = vmax.xlane.f32.xlu0 %v674_v5 }
 0x2f9   : > { %v672_v6 = vpop.f32.mrf.mxu3 }
 0x2fc   : > { %552 = vrot.lane.b32.xlu1 %v1474_v27, %s1284_s19  ;;  %s766_s19 = sshll.u32 %s359_s30, 4  ;;  %s767_s19 = int_to_ptr.vmem [resolvable:$true] %s766_s19 }
 0x356   : > { %v542_v7 = vpop.xlane.xlu1 %541 }
 0x357   : > { %v543_v8 = vsub.f32 %v536_v1, %v542_v7 }
 0x359   : > { %v544_v9 = vmul.f32 1.442695, %v543_v8 }
 0x35b   : > { %1053 = vpow2.f32 %v544_v9 }
 0x361   : > { %v1054_v10 = vpop.eup %1053 }
 0x362   : > { %v546_v11 = vsel %vm450_vm2, %v1054_v10, 0.0 }
 0x363   : > { %547 = vadd.xlane.f32.xlu2 %v546_v11 }
 0x366   : > { %v676_v12 = vpop.xlane.xlu0 %675 }
 0x367   : > { %v677_v13 = vsub.f32 %v670_v4, %v676_v12 }
 0x369   : > { %v678_v14 = vmul.f32 1.442695, %v677_v13 }
 0x36b   : > { %1055 = vpow2.f32 %v678_v14 }
 0x36c   : > { %1057 = vrcp.f32 %v615_v19 }
 0x36e   : > { %v553_v15 = vpop.permute.xlu1 %552 }
 0x36f   : > { %v558_v16 = vsel %vm490_vm3, %v553_v15, 0 }
 0x370   : > { %567 = vmatpush.bf16.msrb.mxu0 %v558_v16 }
 0x371   : > { %v1056_v17 = vpop.eup %1055 }
 0x372   : > { %v680_v18 = vsel %vm450_vm2, %v1056_v17, 0.0  ;;  %v1058_v21 = vpop.eup %1057 }
 0x373   : > { %681 = vadd.xlane.f32.xlu0 %v680_v18  ;;  %v617_v24 = vmul.f32 %v1058_v21, %v1050_v55 }
 0x375   : > { %v618_v29 = vpack.c.bf16 %v617_v24, %v617_v24 }
 0x37b   : > { %619 = vrot.lane.b32.xlu2 %v1470_v23, %s1285_s11  ;;  %s768_s11 = sshll.u32 %s764_s15, 4  ;;  %s769_s11 = int_to_ptr.hbm [resolvable:$true] %s768_s11 }
 0x37c   : > { %s1197_s27 = sshra.s32 %s769_s11, 4  ;;  %s1198_s27 = int_to_ptr.hbm [resolvable:$true] %s1197_s27 }
 0x37d   : > { %p1204_p10 = scmp.lt.s32.totalorder %s1198_s27, %s1554_s7 }
 0x387   : > { %686 = vrot.lane.b32.xlu0 %v652_v49, %s1286_s17  ;;  %s753_s17 = scalar_lea.sflag [#allocation6], %s1443_s3 }
 0x3d6   : > { %v548_v20 = vpop.xlane.xlu2 %547 }
 0x3d7   : > { %1059 = vrcp.f32 %v548_v20 }
 0x3dd   : > { %v1060_v22 = vpop.eup %1059 }
 0x3de   : > { %v550_v25 = vmul.f32 %v1060_v22, %v1054_v10  ;;  %v620_v26 = vpop.permute.xlu2 %619 }
 0x3df   : > { %v625_v27 = vsel %vm490_vm3, %v620_v26, 0 }
 0x3e0   : > { %634 = vmatpush.bf16.msrb.mxu2 %v625_v27  ;;  %v551_v28 = vpack.c.bf16 %v550_v25, %v550_v25 }
 0x3e2   : > { %915 = vmatmul.msk.bf16.vlgmr.msrb.gmra.mxu0 %vm450_vm2, %v551_v28 }
 0x3e3   : > { %917 = vmatmul.msk.bf16.vlgmr.msrb.gmra.mxu2 %vm450_vm2, %v618_v29 }
 0x3e6   : > { %v682_v23 = vpop.xlane.xlu0 %681 }
 0x3e7   : > { %1061 = vrcp.f32 %v682_v23 }
 0x3ed   : > { %v1062_v30 = vpop.eup %1061 }
 0x3ee   : > { %v684_v31 = vmul.f32 %v1062_v30, %v1056_v17 }
 0x3f0   : > { %v685_v34 = vpack.c.bf16 %v684_v31, %v684_v31 }
 0x3f9   : > { %v687_v32 = vpop.permute.xlu0 %686 }
 0x3fa   : > { %v692_v33 = vsel %vm490_vm3, %v687_v32, 0 }
 0x3fb   : > { %701 = vmatpush.bf16.msra.mxu0 %v692_v33 }
 0x3fe   : > { %919 = vmatmul.msk.bf16.vlgmr.msra.gmra.mxu0 %vm450_vm2, %v685_v34 }
 0x45f   : > { %v569_v35 = vpop.f32.mrf.mxu0 }
 0x460   : > { %v573_v36 = vpack.c.bf16 %v569_v35, %v569_v35 }
 0x462   : > { %575 = vrot.lane.b32.xlu1 %v573_v36, %s1287_s9  ;;  %s1199_s9 = scalar_lea.hbm %s1198_s27, 8 }
 0x463   : > { %p1200_p1 = scmp.ne.s32.totalorder %s1198_s27, %s1199_s9  ;;  %p1205_p11 = scmp.lt.s32.totalorder %s1203_s12, %s1199_s9 }
 0x465   : > { %p1201_p3 = pnand %p1200_p1, %p1421_p4  ;;  %p1206_p12 = por %p1205_p11, %p1204_p10 }
 0x466   : > { %v636_v37 = vpop.f32.mrf.mxu2 }
 0x467   : > { %v640_v38 = vpack.c.bf16 %v636_v37, %v636_v37  ;;  %v571_v39 = vpop.f32.mrf.mxu0  ;;  %p1202_p9 = pneg %p1201_p3 }
 0x469   : > { %p1207_p13 = pnand %p1206_p12, %p1202_p9 }
 0x46a   : > { %642 = vrot.lane.b32.xlu1 %v640_v38, %s1288_s13 }
 0x46e   : > { %v638_v40 = vpop.f32.mrf.mxu2 }
 0x47b   : > { %v703_v41 = vpop.f32.mrf.mxu0 }
 0x47c   : > { %v707_v42 = vpack.c.bf16 %v703_v41, %v703_v41 }
 0x47e   : > { %709 = vrot.lane.b32.xlu2 %v707_v42, %s1289_s1 }
 0x483   : > { %v705_v43 = vpop.f32.mrf.mxu0 }
 0x4d4   : > { %v576_v46 = vpop.permute.xlu1 %575 }
 0x4d5   : > { %579 = vst.msk [vmem:[#allocation3] sm:$0xf] %vm578_vm5, %v576_v46 }
 0x4d8   : > { %v710_v48 = vpop.permute.xlu2 %709 }
 0x4dc   : > { %v643_v47 = vpop.permute.xlu1 %642 }
 0x4dd   : > { %646 = vst.msk [vmem:[#allocation3] sm:$0xf] %vm645_vm6, %v643_v47 }
 0x4de   : > { %713 = vst.msk [vmem:[#allocation3] sm:$0xf] %vm712_vm7, %v710_v48 }
 0x4e5   : > { %v714_v49 = vld [vmem:[#allocation3] sm:$0xf] }
 0x4e6   : > { %928 = vmatmul.msk.bf16.vlgmr.msra.gmra.mxu1 %vm387_vm0, %v714_v49 }
 0x563   : > { %v747_v51 = vpop.f32.mrf.mxu1 }
 0x564   : > { %v748_v52 = vadd.f32 %v1046_v50, %v747_v51 }
 0x566   : > { %751 = vst [vmem:[%s359_s30] sm:$0xff] %v748_v52 }
 0x567   : > { %1210 = shalt.err (!%p1207_p13)
}
 0x568   : > { %953 = dma.vmem_to_hbm [thread:$0]  (%p1421_p4), %s767_s19, 128, %s769_s11, %s753_s17  }
 0x56b   : > { %v749_v53 = vpop.f32.mrf.mxu1 }
 0x56c PF: > { %s780_s3 = sand.u32 1, %s1253_s24   ;;  %p970_p0 = pnand %p885_p6, %p1429_p7 }
 0x56d   : > { %s781_s18 = scalar_lea.sflag [#allocation6], %s780_s3 }
 0x56e   : > { %p971_p2 = pneg %p970_p0 }
 0x570   : > { %1248 = dma.done.wait (%p971_p2), %s781_s18, 128  }
 0x571   : > { %1250 = vsyncadd (%p971_p2), %s781_s18, 4294967168  ;;  %s25_s29 = sadd.s32 1, %s1273_s29   ;;  %s1566_s24 = smov %s1257_s25 }
 0x572   : > { %p22_p5 = scmp.ge.s32.totalorder %s25_s29, 4   ;;  %s1567_s25 = smov %s1261_s26 }
 0x573   : > { %s1568_s26 = smov %s1427_s21  ;;  %s1569_s27 = smov %s1269_s28 }
 0x574   : > { %s1570_s28 = smov %s1572_s14  ;;  %24 = sbr.rel (!%p22_p5) target bundleno = 11 (0xb), region = 110 }
 0x579   :  { %787 = vsyncpa [#allocation5], 1 }
 0x57a   :  { %789 = vsyncpa [#allocation5 + $0x1], 1 }
 0x57b   :  { %790 = vsyncpa [#allocation8], 1 }
 0x57c   :  { %791 = vsyncpa [#allocation11], 1 }
 0x57d   :  { %792 = vsyncpa [#allocation6], 1 }
 0x57e   :  { %794 = vsyncpa [#allocation6 + $0x1], 1 }

// kernel: tpu_custom_call.1
= control target key start
LH: loop header
LB: loop body
LE: loop exit
PB: predicated region body
PF: predicated region fallthrough
CT: control target
= control target key end

     0   :  { %s1547_s0 = inlined_call_operand.hbm [shape: f32[2,8,32], index: 0, kind: input, shape index: {}]   ;;  %s1548_s1 = inlined_call_operand.hbm [shape: bf16[32,32], index: 1, kind: input, shape index: {}]   ;;  %s1549_s2 = inlined_call_operand.vmem [shape: f32[1,32], index: 2, kind: input, shape index: {}]   ;;  %s1550_s3 = inlined_call_operand.hbm [shape: bf16[32,64], index: 3, kind: input, shape index: {}]   ;;  %s1551_s4 = inlined_call_operand.vmem [shape: f32[1,64], index: 4, kind: input, shape index: {}]   ;;  %s1552_s5 = inlined_call_operand.hbm [shape: bf16[32,128], index: 5, kind: input, shape index: {}]   ;;  %s1553_s6 = inlined_call_operand.vmem [shape: f32[1,128], index: 6, kind: input, shape index: {}]   ;;  %s1554_s7 = inlined_call_operand.hbm [shape: f32[2,8,128], index: 7, kind: output, shape index: {}]  }
   0x1   :  { %1555 = sst [smem:[#allocation17_spill]] %s1548_s1 }
   0x2   :  { %1556 = sst [smem:[#allocation18_spill]] %s1550_s3 }
   0x3   :  { %12 = vsyncpa [#allocation5], 0 }
   0x4   :  { %14 = vsyncpa [#allocation5 + $0x1], 0 }
   0x5   :  { %15 = vsyncpa [#allocation8], 0 }
   0x6   :  { %16 = vsyncpa [#allocation11], 0 }
   0x7   :  { %17 = vsyncpa [#allocation6], 0 }
   0x8   :  { %19 = vsyncpa [#allocation6 + $0x1], 0  ;;  %s1330_s24 = smov 0   ;;  %s1332_s25 = smov 0  }
   0x9   :  { %s1334_s26 = smov 0   ;;  %s1336_s27 = smov 0  }
   0xa   :  { %s1338_s28 = smov 0   ;;  %s1340_s29 = smov 0  }
   0xb LB: > { %s879_s30 = sadd.s32 4294967295, %s1273_s29   ;;  %p881_p0 = scmp.ge.s32.totalorder %s1273_s29, 1  ;;  %s1273_s29 = sphi %s1340_s29, %s25_s29   ;;  %s1269_s28 = sphi %s1338_s28, %s1570_s28   ;;  %s1265_s27 = sphi %s1336_s27, %s1569_s27   ;;  %s1261_s26 = sphi %s1334_s26, %s1568_s26   ;;  %s1257_s25 = sphi %s1332_s25, %s1567_s25   ;;  %s1253_s24 = sphi %s1330_s24, %s1566_s24  }
   0xc   : > { %p1364_p1 = scmp.eq.s32.totalorder %s879_s30, 0  ;;  %p222_p2 = scmp.lt.s32.totalorder %s1273_s29, 3 }
   0xd   : > { %s1558_s1 = sld [smem:[#allocation17_spill]]  ;;  %s1275_s13 = smov [#allocation7]  }
   0xe   : > { %p1372_p3 = pnand %p881_p0, %p222_p2  ;;  %s235_s14 = sshll.u32 %s1275_s13, 4  ;;  %s236_s14 = int_to_ptr.vmem [resolvable:$true] %s235_s14 }
   0xf   : > { %p885_p6 = scmp.ge.s32.totalorder %s1273_s29, 2  ;;  %s1561_s3 = sld [smem:[#allocation18_spill]] }
  0x10   : > { %p955_p4 = pneg %p1372_p3  ;;  %s1276_s19 = smov 64  }
  0x11   : > { %s1277_s20 = smov 4   ;;  %s1278_s21 = smov [#allocation9]  }
  0x12   : > { %p1380_p5 = pnand %p955_p4, %p1364_p1  ;;  %s252_s22 = sshll.u32 %s1278_s21, 4  ;;  %s253_s22 = int_to_ptr.vmem [resolvable:$true] %s252_s22 }
  0x13   : > { %s233_s11 = sshll.u32 %s1558_s1, 4  ;;  %s267_s10 = sshll.u32 %s1552_s5, 4  ;;  %s234_s11 = int_to_ptr.hbm [resolvable:$true] %s233_s11  ;;  %s268_s10 = int_to_ptr.hbm [resolvable:$true] %s267_s10 }
  0x14   : > { %958 = dma.hbm_to_vmem [thread:$0]  (!%p1380_p5), %s234_s11, 256, %s236_s14, [#allocation8], %s1276_s19, %s1276_s19, %s1277_s20  }
  0x15   : > { %s250_s18 = sshll.u32 %s1561_s3, 4  ;;  %s1279_s13 = smov [#allocation10]   ;;  %s251_s18 = int_to_ptr.hbm [resolvable:$true] %s250_s18 }
  0x16   : > { %961 = dma.hbm_to_vmem [thread:$0]  (!%p1380_p5), %s251_s18, 256, %s253_s22, [#allocation8], %s1276_s19, %s1276_s19, %s1277_s20  }
  0x17   : > { %s269_s16 = sshll.u32 %s1279_s13, 4  ;;  %s880_s11 = sadd.s32 4294967294, %s1273_s29   ;;  %s270_s16 = int_to_ptr.vmem [resolvable:$true] %s269_s16 }
  0x18   : > { %964 = dma.hbm_to_vmem [thread:$0]  (!%p1380_p5), %s268_s10, 256, %s270_s16, [#allocation11], %s1276_s19, %s1276_s19, %s1277_s20  }
  0x19   : > { %s37_s14 = sadd.s32 1, %s1269_s28  ;;  %s44_s17 = sadd.s32 1, %s1261_s26 }
  0x1a   : > { %p39_p7 = scmp.ge.s32.totalorder %s37_s14, 2  ;;  %p51_p8 = scmp.ne.s32.totalorder %s1261_s26, %s1257_s25 }
  0x1b   : > { %p52_p9 = scmp.eq.s32.totalorder %s1273_s29, 0  ;;  %p57_p10 = scmp.ne.s32.totalorder %s1257_s25, %s1253_s24 }
  0x1c   : > { %s1572_s14 = smov (%p39_p7, %s37_s14), 0  ;;  %p209_p13 = scmp.eq.s32.totalorder %s879_s30, 1 }
  0x1d   : > { %p1407_p11 = por %p52_p9, %p51_p8  ;;  %p1413_p12 = por %p1364_p1, %p57_p10 }
  0x1e   : > { %s41_s19 = ssub.s32 %s1269_s28, %s1572_s14  ;;  %p215_p2 = scmp.eq.s32.totalorder %s880_s11, 1 }
  0x1f   : > { %p42_p0 = scmp.eq.s32.totalorder %s41_s19, 0  ;;  %p1421_p4 = por %p209_p13, %p51_p8 }
  0x20   : > { %p976_p5 = scmp.lt.s32.totalorder %s1273_s29, 2  ;;  %p1429_p7 = por %p215_p2, %p57_p10 }
  0x21   : > { %s1427_s21 = scalar_select %p42_p0, %s1261_s26, %s44_s17  }
  0x22   : > { %s286_s23 = sand.u32 1, %s1261_s26   ;;  %s887_s10 = sshll.u32 %s1269_s28, 3 }
  0x23   : > { %s886_s9 = sshll.u32 %s286_s23, 3  ;;  %s294_s30 = scalar_lea.hbm %s1547_s0, %s887_s10 }
  0x24   : > { %s290_s19 = scalar_lea.vmem [#allocation4], %s886_s9  ;;  %s296_s1 = sshll.u32 %s294_s30, 4  ;;  %s297_s1 = int_to_ptr.hbm [resolvable:$true] %s296_s1 }
  0x25   : > { %s298_s11 = sshll.u32 %s290_s19, 4  ;;  %p966_p8 = pnand %p976_p5, %p1407_p11  ;;  %s299_s11 = int_to_ptr.vmem [resolvable:$true] %s298_s11 }
  0x26   : > { %s287_s17 = scalar_lea.sflag [#allocation5], %s286_s23  ;;  %307 = sbr.rel (%p1372_p3) target bundleno = 1388 (0x56c), region = 48 }
  0x27   : > { %968 = dma.hbm_to_vmem [thread:$0]  (!%p966_p8), %s297_s1, 128, %s299_s11, %s287_s17  }
  0x28   : > { %s1443_s3 = sand.u32 (!%p1372_p3), 1, %s1257_s25  }
  0x29   : > { %s889_s10 = sshll.u32 (!%p1372_p3), %s1443_s3, 3  ;;  %s310_s9 = scalar_lea.sflag (!%p1372_p3), [#allocation5], %s1443_s3 }
  0x2a   : > { %s313_s13 = scalar_lea.vmem (!%p1372_p3), [#allocation4], %s889_s10 }
  0x2b   : > { %1236 = dma.done.wait (%p1413_p12), %s310_s9, 128  }
  0x2c   : > { %1238 = vsyncadd (%p1413_p12), %s310_s9, 4294967168 }
  0x2d   : > { %1240 = dma.done.wait (%p1364_p1), [#allocation8], 512  }
  0x2e   : > { %1242 = vsyncadd (%p1364_p1), [#allocation8], 4294966784 }
  0x2f   : > { %1244 = dma.done.wait (%p1364_p1), [#allocation11], 256  }
  0x30   : > { %1246 = vsyncadd (%p1364_p1), [#allocation11], 4294967040  ;;  %v934_v0 = vld [vmem:[#allocation9 + $0x8] sm:$0xff]  ;;  %v936_v1 = vld [vmem:[#allocation7 + $0x8] sm:$0xff]  ;;  %vm387_vm0 = vcmask 261120   ;;  %vm405_vm1 = vcmask 519168  }
  0x31   : > { %v933_v2 = vld [vmem:[#allocation9] sm:$0xff]  ;;  %v935_v3 = vld [vmem:[#allocation7] sm:$0xff]  ;;  %397 = vmatpush.bf16.msra.mxu0 %v934_v0  ;;  %441 = vmatpush.bf16.msra.mxu1 %v936_v1  ;;  %v1044_v6 = vld [vmem:[%s1551_s4] ss:$0 sm:$0xff]  ;;  %s1280_s15 = smov 120   ;;  %vm450_vm2 = vcmask 64512  }
  0x32   : > { %v365_v4 = vld [vmem:[%s313_s13] sm:$0xff]  ;;  %v1045_v7 = vld [vmem:[%s1549_s2] ss:$0 sm:$0xff]  ;;  %s1281_s23 = smov 112   ;;  %s1282_s16 = smov 96   ;;  %vm490_vm3 = vcmask 1043456  }
  0x33   : > { %v366_v5 = vpack.c.bf16 %v365_v4, %v365_v4  ;;  %s1283_s30 = smov 104   ;;  %vm508_vm4 = vcmask 60416   ;;  %s1284_s19 = smov 88   ;;  %vm578_vm5 = vcmask 126016   ;;  %vm645_vm6 = vcmask 191616  }
  0x34   : > { %s1285_s11 = smov 80   ;;  %s1286_s17 = smov 72   ;;  %vm712_vm7 = vcmask 257216  }
  0x35   : > { %398 = vmatpush.bf16.msra.mxu0 %v933_v2  ;;  %442 = vmatpush.bf16.msra.mxu1 %v935_v3  ;;  %s1287_s9 = smov 8   ;;  %s1288_s13 = smov 16  }
  0x36   : > { %s1289_s1 = smov 24   ;;  %s930_s12 = sshll.u32 %s1265_s27, 3 }
  0x38   : > { %902 = vmatmul.msk.bf16.vlgmr.msra.gmra.mxu0 %vm387_vm0, %v366_v5  ;;  %911 = vmatmul.msk.bf16.vlgmr.msra.gmra.mxu1 %vm387_vm0, %v366_v5 }
  0xb5   : > { %v400_v8 = vpop.f32.mrf.mxu0  ;;  %v444_v9 = vpop.f32.mrf.mxu1 }
  0xb6   : > { %v401_v10 = vadd.f32 %v1044_v6, %v400_v8  ;;  %v445_v11 = vadd.f32 %v1045_v7, %v444_v9 }
  0xb8   : > { %v404_v12 = vpack.c.bf16 %v401_v10, %v401_v10  ;;  %v448_v13 = vpack.c.bf16 %v445_v11, %v445_v11 }
  0xba   : > { %406 = vst.msk [vmem:[#allocation2] sm:$0xf] %vm405_vm1, %v404_v12  ;;  %v512_v14 = vunpack.c.l.b16 %v448_v13 }
  0xbc   : > { %v513_v15 = vpack.c.b16 %v512_v14, %v512_v14 }
  0xbd   : > { %v402_v16 = vpop.f32.mrf.mxu0  ;;  %v446_v17 = vpop.f32.mrf.mxu1 }
  0xbe   : > { %514 = vrot.lane.b32.xlu2 %v513_v15, %s1280_s15 }
  0xc1   : > { %v449_v18 = vld [vmem:[#allocation2] sm:$0xf] }
  0xc2   : > { %v580_v19 = vld [vmem:[#allocation2] sm:$0xf]  ;;  %v455_v20 = vsel %vm450_vm2, %v449_v18, 0  ;;  %v483_v21 = vunpack.c.l.b16 %v449_v18 }
  0xc3   : > { %v584_v22 = vunpack.c.l.b16 %v580_v19  ;;  %464 = vmatpush.bf16.xpose.msra.mxu2 %v455_v20  ;;  %v510_v25 = vld [vmem:[#allocation2] sm:$0xf] }
  0xc4   : > { %v484_v24 = vpack.c.b16 %v483_v21, %v483_v21  ;;  %v517_v26 = vunpack.c.l.b16 %v510_v25  ;;  %v647_v47 = vld [vmem:[#allocation2] sm:$0xf] }
  0xc5   : > { %v1470_v23 = vpack.c.b16 %v584_v22, %v584_v22  ;;  %v651_v48 = vunpack.c.l.b16 %v647_v47 }
  0xc6   : > { %485 = vrot.lane.b32.xlu1 %v484_v24, %s1282_s16  ;;  %v1474_v27 = vpack.c.b16 %v517_v26, %v517_v26 }
  0xc7   : > { %586 = vrot.lane.b32.xlu2 %v1470_v23, %s1281_s23  ;;  %v652_v49 = vpack.c.b16 %v651_v48, %v651_v48 }
  0xca   : > { %912 = vmatmul.msk.bf16.vlgmr.msra.gmra.mxu2 %vm450_vm2, %v448_v13 }
  0xce   : > { %519 = vrot.lane.b32.xlu1 %v1474_v27, %s1280_s15  ;;  %s764_s15 = scalar_lea.hbm %s1554_s7, %s930_s12  ;;  %s1203_s12 = scalar_lea.hbm %s1554_s7, 16 }
  0xcf   : > { %648 = vrot.lane.b32.xlu2 %v513_v15, %s1283_s30 }
  0xd6   : > { %581 = vrot.lane.b32.xlu1 %v513_v15, %s1281_s23 }
 0x118   : > { %v515_v28 = vpop.permute.xlu2 %514 }
 0x121   : > { %v587_v29 = vpop.permute.xlu2 %586 }
 0x122   : > { %v592_v30 = vsel %vm450_vm2, %v587_v29, 0 }
 0x123   : > { %601 = vmatpush.bf16.xpose.msrb.mxu1 %v592_v30 }
 0x129   : > { %v649_v50 = vpop.permute.xlu2 %648 }
 0x138   : > { %v486_v31 = vpop.permute.xlu1 %485 }
 0x139   : > { %v492_v32 = vsel %vm490_vm3, %v486_v31, 0 }
 0x13a   : > { %501 = vmatpush.bf16.msra.mxu3 %v492_v32 }
 0x140   : > { %v520_v33 = vpop.permute.xlu1 %519 }
 0x141   : > { %v525_v34 = vsel %vm450_vm2, %v520_v33, 0 }
 0x142   : > { %534 = vmatpush.bf16.xpose.msrb.mxu3 %v525_v34 }
 0x148   : > { %v582_v35 = vpop.permute.xlu1 %581 }
 0x149   : > { %916 = vmatmul.msk.bf16.vlgmr.msrb.gmra.mxu1 %vm450_vm2, %v582_v35 }
 0x14d   : > { %v466_v36 = vpop.f32.mrf.mxu2 }
 0x14e   : > { %v470_v37 = vsel %vm450_vm2, %v466_v36, -inf }
 0x14f   : > { %471 = vmax.xlane.f32.xlu0 %v470_v37 }
 0x155   : > { %v468_v38 = vpop.f32.mrf.mxu2 }
 0x1c2   : > { %v472_v39 = vpop.xlane.xlu0 %471 }
 0x1c3   : > { %v473_v40 = vsub.f32 %v466_v36, %v472_v39 }
 0x1c5   : > { %v474_v41 = vmul.f32 1.442695, %v473_v40 }
 0x1c6   : > { %v603_v42 = vpop.f32.mrf.mxu1 }
 0x1c7   : > { %1047 = vpow2.f32 %v474_v41  ;;  %v607_v43 = vsel %vm450_vm2, %v603_v42, -inf }
 0x1c8   : > { %608 = vmax.xlane.f32.xlu2 %v607_v43 }
 0x1cd   : > { %v1048_v44 = vpop.eup %1047 }
 0x1ce   : > { %v605_v45 = vpop.f32.mrf.mxu1  ;;  %v476_v46 = vsel %vm450_vm2, %v1048_v44, 0.0 }
 0x1cf   : > { %477 = vadd.xlane.f32.xlu0 %v476_v46  ;;  %v937_v45 = vld [vmem:[#allocation10] sm:$0xff] }
 0x1e3   : > { %653 = vrot.lane.b32.xlu0 %v652_v49, %s1283_s30  ;;  %s359_s30 = scalar_lea.vmem [#allocation12], %s889_s10 }
 0x23b   : > { %v609_v51 = vpop.xlane.xlu2 %608 }
 0x23c   : > { %v610_v52 = vsub.f32 %v603_v42, %v609_v51 }
 0x23e   : > { %v611_v53 = vmul.f32 1.442695, %v610_v52 }
 0x240   : > { %1049 = vpow2.f32 %v611_v53 }
 0x242   : > { %v478_v54 = vpop.xlane.xlu0 %477 }
 0x243   : > { %1051 = vrcp.f32 %v478_v54 }
 0x246   : > { %v1050_v55 = vpop.eup %1049 }
 0x247   : > { %v613_v56 = vsel %vm450_vm2, %v1050_v55, 0.0 }
 0x248   : > { %614 = vadd.xlane.f32.xlu2 %v613_v56 }
 0x249   : > { %v1052_v57 = vpop.eup %1051 }
 0x24a   : > { %v480_v58 = vmul.f32 %v1052_v57, %v1048_v44  ;;  %v938_v44 = vld [vmem:[#allocation10 + $0x8] sm:$0xff] }
 0x24b   : > { %744 = vmatpush.bf16.msra.mxu1 %v938_v44 }
 0x24c   : > { %v481_v59 = vpack.c.bf16 %v480_v58, %v480_v58 }
 0x24e   : > { %913 = vmatmul.msk.bf16.vlgmr.msra.gmra.mxu3 %vm450_vm2, %v481_v59 }
 0x24f   : > { %745 = vmatpush.bf16.msra.mxu1 %v937_v45 }
 0x255   : > { %v654_v60 = vpop.permute.xlu0 %653 }
 0x256   : > { %v659_v61 = vsel %vm450_vm2, %v654_v60, 0 }
 0x257   : > { %668 = vmatpush.bf16.xpose.msra.mxu3 %v659_v61 }
 0x25e   : > { %914 = vmatmul.msk.bf16.vlgmr.msrb.gmra.mxu3 %vm450_vm2, %v515_v28 }
 0x26e   : > { %918 = vmatmul.msk.bf16.vlgmr.msra.gmra.mxu3 %vm450_vm2, %v649_v50  ;;  %v1046_v50 = vld [vmem:[%s1553_s6] ss:$0 sm:$0xff] }
 0x2bb   : > { %v615_v19 = vpop.xlane.xlu2 %614 }
 0x2d1   : > { %v503_v62 = vpop.f32.mrf.mxu3 }
 0x2d2   : > { %v507_v63 = vpack.c.bf16 %v503_v62, %v503_v62 }
 0x2d4   : > { %509 = vst.msk [vmem:[#allocation3] sm:$0xf] %vm508_vm4, %v507_v63 }
 0x2d9   : > { %v505_v0 = vpop.f32.mrf.mxu3 }
 0x2e1   : > { %v536_v1 = vpop.f32.mrf.mxu3 }
 0x2e2   : > { %v540_v2 = vsel %vm450_vm2, %v536_v1, -inf }
 0x2e3   : > { %541 = vmax.xlane.f32.xlu1 %v540_v2 }
 0x2e9   : > { %v538_v3 = vpop.f32.mrf.mxu3 }
 0x2f1   : > { %v670_v4 = vpop.f32.mrf.mxu3 }
 0x2f2   : > { %v674_v5 = vsel %vm450_vm2, %v670_v4, -inf }
 0x2f3   : > { %675 = vmax.xlane.f32.xlu0 %v674_v5 }
 0x2f9   : > { %v672_v6 = vpop.f32.mrf.mxu3 }
 0x2fc   : > { %552 = vrot.lane.b32.xlu1 %v1474_v27, %s1284_s19  ;;  %s766_s19 = sshll.u32 %s359_s30, 4  ;;  %s767_s19 = int_to_ptr.vmem [resolvable:$true] %s766_s19 }
 0x356   : > { %v542_v7 = vpop.xlane.xlu1 %541 }
 0x357   : > { %v543_v8 = vsub.f32 %v536_v1, %v542_v7 }
 0x359   : > { %v544_v9 = vmul.f32 1.442695, %v543_v8 }
 0x35b   : > { %1053 = vpow2.f32 %v544_v9 }
 0x361   : > { %v1054_v10 = vpop.eup %1053 }
 0x362   : > { %v546_v11 = vsel %vm450_vm2, %v1054_v10, 0.0 }
 0x363   : > { %547 = vadd.xlane.f32.xlu2 %v546_v11 }
 0x366   : > { %v676_v12 = vpop.xlane.xlu0 %675 }
 0x367   : > { %v677_v13 = vsub.f32 %v670_v4, %v676_v12 }
 0x369   : > { %v678_v14 = vmul.f32 1.442695, %v677_v13 }
 0x36b   : > { %1055 = vpow2.f32 %v678_v14 }
 0x36c   : > { %1057 = vrcp.f32 %v615_v19 }
 0x36e   : > { %v553_v15 = vpop.permute.xlu1 %552 }
 0x36f   : > { %v558_v16 = vsel %vm490_vm3, %v553_v15, 0 }
 0x370   : > { %567 = vmatpush.bf16.msrb.mxu0 %v558_v16 }
 0x371   : > { %v1056_v17 = vpop.eup %1055 }
 0x372   : > { %v680_v18 = vsel %vm450_vm2, %v1056_v17, 0.0  ;;  %v1058_v21 = vpop.eup %1057 }
 0x373   : > { %681 = vadd.xlane.f32.xlu0 %v680_v18  ;;  %v617_v24 = vmul.f32 %v1058_v21, %v1050_v55 }
 0x375   : > { %v618_v29 = vpack.c.bf16 %v617_v24, %v617_v24 }
 0x37b   : > { %619 = vrot.lane.b32.xlu2 %v1470_v23, %s1285_s11  ;;  %s768_s11 = sshll.u32 %s764_s15, 4  ;;  %s769_s11 = int_to_ptr.hbm [resolvable:$true] %s768_s11 }
 0x37c   : > { %s1197_s27 = sshra.s32 %s769_s11, 4  ;;  %s1198_s27 = int_to_ptr.hbm [resolvable:$true] %s1197_s27 }
 0x37d   : > { %p1204_p10 = scmp.lt.s32.totalorder %s1198_s27, %s1554_s7 }
 0x387   : > { %686 = vrot.lane.b32.xlu0 %v652_v49, %s1286_s17  ;;  %s753_s17 = scalar_lea.sflag [#allocation6], %s1443_s3 }
 0x3d6   : > { %v548_v20 = vpop.xlane.xlu2 %547 }
 0x3d7   : > { %1059 = vrcp.f32 %v548_v20 }
 0x3dd   : > { %v1060_v22 = vpop.eup %1059 }
 0x3de   : > { %v550_v25 = vmul.f32 %v1060_v22, %v1054_v10  ;;  %v620_v26 = vpop.permute.xlu2 %619 }
 0x3df   : > { %v625_v27 = vsel %vm490_vm3, %v620_v26, 0 }
 0x3e0   : > { %634 = vmatpush.bf16.msrb.mxu2 %v625_v27  ;;  %v551_v28 = vpack.c.bf16 %v550_v25, %v550_v25 }
 0x3e2   : > { %915 = vmatmul.msk.bf16.vlgmr.msrb.gmra.mxu0 %vm450_vm2, %v551_v28 }
 0x3e3   : > { %917 = vmatmul.msk.bf16.vlgmr.msrb.gmra.mxu2 %vm450_vm2, %v618_v29 }
 0x3e6   : > { %v682_v23 = vpop.xlane.xlu0 %681 }
 0x3e7   : > { %1061 = vrcp.f32 %v682_v23 }
 0x3ed   : > { %v1062_v30 = vpop.eup %1061 }
 0x3ee   : > { %v684_v31 = vmul.f32 %v1062_v30, %v1056_v17 }
 0x3f0   : > { %v685_v34 = vpack.c.bf16 %v684_v31, %v684_v31 }
 0x3f9   : > { %v687_v32 = vpop.permute.xlu0 %686 }
 0x3fa   : > { %v692_v33 = vsel %vm490_vm3, %v687_v32, 0 }
 0x3fb   : > { %701 = vmatpush.bf16.msra.mxu0 %v692_v33 }
 0x3fe   : > { %919 = vmatmul.msk.bf16.vlgmr.msra.gmra.mxu0 %vm450_vm2, %v685_v34 }
 0x45f   : > { %v569_v35 = vpop.f32.mrf.mxu0 }
 0x460   : > { %v573_v36 = vpack.c.bf16 %v569_v35, %v569_v35 }
 0x462   : > { %575 = vrot.lane.b32.xlu1 %v573_v36, %s1287_s9  ;;  %s1199_s9 = scalar_lea.hbm %s1198_s27, 8 }
 0x463   : > { %p1200_p1 = scmp.ne.s32.totalorder %s1198_s27, %s1199_s9  ;;  %p1205_p11 = scmp.lt.s32.totalorder %s1203_s12, %s1199_s9 }
 0x465   : > { %p1201_p3 = pnand %p1200_p1, %p1421_p4  ;;  %p1206_p12 = por %p1205_p11, %p1204_p10 }
 0x466   : > { %v636_v37 = vpop.f32.mrf.mxu2 }
 0x467   : > { %v640_v38 = vpack.c.bf16 %v636_v37, %v636_v37  ;;  %v571_v39 = vpop.f32.mrf.mxu0  ;;  %p1202_p9 = pneg %p1201_p3 }
 0x469   : > { %p1207_p13 = pnand %p1206_p12, %p1202_p9 }
 0x46a   : > { %642 = vrot.lane.b32.xlu1 %v640_v38, %s1288_s13 }
 0x46e   : > { %v638_v40 = vpop.f32.mrf.mxu2 }
 0x47b   : > { %v703_v41 = vpop.f32.mrf.mxu0 }
 0x47c   : > { %v707_v42 = vpack.c.bf16 %v703_v41, %v703_v41 }
 0x47e   : > { %709 = vrot.lane.b32.xlu2 %v707_v42, %s1289_s1 }
 0x483   : > { %v705_v43 = vpop.f32.mrf.mxu0 }
 0x4d4   : > { %v576_v46 = vpop.permute.xlu1 %575 }
 0x4d5   : > { %579 = vst.msk [vmem:[#allocation3] sm:$0xf] %vm578_vm5, %v576_v46 }
 0x4d8   : > { %v710_v48 = vpop.permute.xlu2 %709 }
 0x4dc   : > { %v643_v47 = vpop.permute.xlu1 %642 }
 0x4dd   : > { %646 = vst.msk [vmem:[#allocation3] sm:$0xf] %vm645_vm6, %v643_v47 }
 0x4de   : > { %713 = vst.msk [vmem:[#allocation3] sm:$0xf] %vm712_vm7, %v710_v48 }
 0x4e5   : > { %v714_v49 = vld [vmem:[#allocation3] sm:$0xf] }
 0x4e6   : > { %928 = vmatmul.msk.bf16.vlgmr.msra.gmra.mxu1 %vm387_vm0, %v714_v49 }
 0x563   : > { %v747_v51 = vpop.f32.mrf.mxu1 }
 0x564   : > { %v748_v52 = vadd.f32 %v1046_v50, %v747_v51 }
 0x566   : > { %751 = vst [vmem:[%s359_s30] sm:$0xff] %v748_v52 }
 0x567   : > { %1210 = shalt.err (!%p1207_p13)
}
 0x568   : > { %953 = dma.vmem_to_hbm [thread:$0]  (%p1421_p4), %s767_s19, 128, %s769_s11, %s753_s17  }
 0x56b   : > { %v749_v53 = vpop.f32.mrf.mxu1 }
 0x56c PF: > { %s780_s3 = sand.u32 1, %s1253_s24   ;;  %p970_p0 = pnand %p885_p6, %p1429_p7 }
 0x56d   : > { %s781_s18 = scalar_lea.sflag [#allocation6], %s780_s3 }
 0x56e   : > { %p971_p2 = pneg %p970_p0 }
 0x570   : > { %1248 = dma.done.wait (%p971_p2), %s781_s18, 128  }
 0x571   : > { %1250 = vsyncadd (%p971_p2), %s781_s18, 4294967168  ;;  %s25_s29 = sadd.s32 1, %s1273_s29   ;;  %s1566_s24 = smov %s1257_s25 }
 0x572   : > { %p22_p5 = scmp.ge.s32.totalorder %s25_s29, 4   ;;  %s1567_s25 = smov %s1261_s26 }
 0x573   : > { %s1568_s26 = smov %s1427_s21  ;;  %s1569_s27 = smov %s1269_s28 }
 0x574   : > { %s1570_s28 = smov %s1572_s14  ;;  %24 = sbr.rel (!%p22_p5) target bundleno = 11 (0xb), region = 110 }
 0x579   :  { %787 = vsyncpa [#allocation5], 1 }
 0x57a   :  { %789 = vsyncpa [#allocation5 + $0x1], 1 }
 0x57b   :  { %790 = vsyncpa [#allocation8], 1 }
 0x57c   :  { %791 = vsyncpa [#allocation11], 1 }
 0x57d   :  { %792 = vsyncpa [#allocation6], 1 }
 0x57e   :  { %794 = vsyncpa [#allocation6 + $0x1], 1 }

</bundles_post_ra>
